<compile_context>
chip_gen: v7x
topology: tpu7x:2x2x1
jax: 0.10.0
libtpu: 0.0.40
codegen_flags: <defaults>
</compile_context>

<pallas_src>
import numpy as np
import jax
import jax.numpy as jnp
from jax.experimental import pallas as pl
from jax.experimental.pallas import tpu as pltpu

K_SIZE = 4
STRIDE = 2
PAD = 1
BN_EPS = 1e-5
LRELU_SLOPE = 0.2
LANES = 128       # lane-dense channel padding
COUT4 = 64        # final conv output channels
KK = K_SIZE * K_SIZE


# ---------------------------------------------------------------------------
# In-kernel helpers
# ---------------------------------------------------------------------------
def _bn_lrelu(y, gb_ref, m_rows):
    """Training-mode BatchNorm (biased batch var) folded into scale/shift + leaky-ReLU.

    Padded lanes have y == 0 and gamma == beta == 0 (zero padding in _pack_gb),
    so scale == shift == 0 and padded lanes stay exactly zero (NaN-free).
    """
    gb = gb_ref[...]
    gamma = gb[0:1, :]
    beta = gb[1:2, :]
    inv_m = 1.0 / m_rows
    s1 = jnp.sum(y, axis=0, keepdims=True)
    s2 = jnp.sum(y * y, axis=0, keepdims=True)
    mean = s1 * inv_m
    var = jnp.maximum(s2 * inv_m - mean * mean, 0.0)
    scale = gamma * jax.lax.rsqrt(var + BN_EPS)
    shift = beta - mean * scale
    z = y * scale + shift
    return jnp.where(z > 0, z, LRELU_SLOPE * z)


def _conv_packed(x, g_ref, w_ref, n):
    """4x4 / stride-2 / pad-1 conv of x (N*Hin*Win rows, 128 lanes; first Cin real).

    1) One stacked gather matmul per sample: G (16*HoWo, HinWin) @ x_b gives the
       16 per-tap, padded, stride-2 row-selected copies of x_b (exact 0/1 pick).
    2) Lane-group packing: tap k's real Cin channels are rolled to lane offset
       (Cin*k mod 128) via pltpu.roll and summed (disjoint support -> exact),
       building patches of width K = 16*Cin (128/256/512) instead of 16*128.
    3) ONE bf16 weight matmul per layer against the tightly packed (K, 128)
       weights, fp32 accumulation.
    """
    hw_in = g_ref.shape[1]
    hw_out = g_ref.shape[0] // KK
    k_total = w_ref.shape[0]                  # 16 * Cin
    cin = k_total // KK
    per_group = min(LANES // cin, KK)         # taps per 128-lane group
    n_groups = KK // per_group
    x_bf = x.astype(jnp.bfloat16)             # exact wrt the 0/1 gather
    g = g_ref[...]

    packs = []
    for b in range(n):
        xb = x_bf[b * hw_in:(b + 1) * hw_in, :]
        gath = jnp.dot(g, xb, preferred_element_type=jnp.float32)
        groups = []
        for grp in range(n_groups):
            base = grp * per_group
            acc = gath[base * hw_out:(base + 1) * hw_out, :]
            for j in range(1, per_group):
                k = base + j
                blk = gath[k * hw_out:(k + 1) * hw_out, :]
                acc = acc + pltpu.roll(blk, cin * j, axis=1)
            groups.append(acc)
        packs.append(groups[0] if n_groups == 1 else
                     jnp.concatenate(groups, axis=1))
    patches = packs[0] if n == 1 else jnp.concatenate(packs, axis=0)
    return jnp.dot(patches.astype(jnp.bfloat16), w_ref[...],
                   preferred_element_type=jnp.float32)


def _disc_kernel(p1_ref, w1_ref, gb1_ref,
                 g2_ref, w2_ref, gb2_ref,
                 g3_ref, w3_ref, gb3_ref,
                 g4_ref, w4_ref, b4_ref,
                 o_ref):
    n = p1_ref.shape[0] // g2_ref.shape[1]    # batch (static at trace time)

    # Layer 1: patches precomputed in the wrapper (Cin=1 -> K=16).
    y1 = jnp.dot(p1_ref[...], w1_ref[...], preferred_element_type=jnp.float32)
    x1 = _bn_lrelu(y1, gb1_ref, float(p1_ref.shape[0]))

    # Layers 2-3: gather + lane-pack + matmul + BN + leaky-ReLU, vreg/VMEM resident.
    x2 = _bn_lrelu(_conv_packed(x1, g2_ref, w2_ref, n), gb2_ref,
                   float(n * (g2_ref.shape[0] // KK)))
    x3 = _bn_lrelu(_conv_packed(x2, g3_ref, w3_ref, n), gb3_ref,
                   float(n * (g3_ref.shape[0] // KK)))

    # Layer 4: conv + bias, then pack samples into one lane-dense (1, N*64) row.
    y4 = _conv_packed(x3, g4_ref, w4_ref, n) + b4_ref[...]
    row = y4[0:1, :]
    for b in range(1, n):
        # padded lanes of y4 are exactly zero, so the rolled halves don't overlap
        row = row + pltpu.roll(y4[b:b + 1, :], COUT4 * b, axis=1)
    o_ref[...] = jax.nn.sigmoid(row[:, :n * COUT4])


# ---------------------------------------------------------------------------
# One-time packing: stacked gather constants + lane-packed bf16 weights
# ---------------------------------------------------------------------------
def _make_gather_stacked(hin, win):
    """Batch-independent (16*Ho*Wo, Hin*Win) 0/1 matrix: row (k, oh, ow) selects
    the padded, stride-2-shifted input row for kernel tap k."""
    ho = (hin + 2 * PAD - K_SIZE) // STRIDE + 1
    wo = (win + 2 * PAD - K_SIZE) // STRIDE + 1
    g = np.zeros((KK * ho * wo, hin * win), np.float32)
    for ky in range(K_SIZE):
        for kx in range(K_SIZE):
            k = ky * K_SIZE + kx
            for oh in range(ho):
                for ow in range(wo):
                    hi = STRIDE * oh + ky - PAD
                    wi = STRIDE * ow + kx - PAD
                    if 0 <= hi < hin and 0 <= wi < win:
                        g[k * ho * wo + oh * wo + ow, hi * win + wi] = 1.0
    return jnp.asarray(g, jnp.bfloat16)   # 0/1 exact in bf16


def _pack_conv_w(w_oihw):
    """(Cout, Cin, 4, 4) -> (16*Cin, 128) bf16, rows ordered (ky, kx, cin) to match
    the lane-group patch packing; Cout zero-padded to 128 lanes."""
    cout, cin, kh, kw = w_oihw.shape
    w = jnp.transpose(w_oihw, (2, 3, 1, 0)).reshape(kh * kw * cin, cout)
    w = jnp.pad(w, ((0, 0), (0, LANES - cout)))
    return w.astype(jnp.bfloat16)


def _pack_gb(gamma, beta):
    c = gamma.shape[0]
    gb = jnp.stack([gamma, beta], axis=0)           # (2, C), fp32
    # zero padding is what keeps padded lanes exactly zero through BN.
    return jnp.pad(gb, ((0, 0), (0, LANES - c)))


def pack_params(params, image_hw):
    """One-time repacking (weights, BN affine, gather constants); batch-independent."""
    h2, h3, h4 = image_hw // 2, image_hw // 4, image_hw // 8
    b4 = params["bias4"]
    return {
        "w1": _pack_conv_w(params["w1"]),
        "gb1": _pack_gb(params["g1"], params["b1"]),
        "gth2": _make_gather_stacked(h2, h2),
        "w2": _pack_conv_w(params["w2"]),
        "gb2": _pack_gb(params["g2"], params["b2"]),
        "gth3": _make_gather_stacked(h3, h3),
        "w3": _pack_conv_w(params["w3"]),
        "gb3": _pack_gb(params["g3"], params["b3"]),
        "gth4": _make_gather_stacked(h4, h4),
        "w4": _pack_conv_w(params["w4"]),
        "b4": jnp.pad(b4, (0, LANES - b4.shape[0])).reshape(1, LANES),
    }


# ---------------------------------------------------------------------------
# Wrapper
# ---------------------------------------------------------------------------
def _im2col_1ch(x_nhwc):
    # Stride-2 4x4 patches of the (single-channel) raw input -> (N*Ho*Wo, 16).
    n, h, w, c = x_nhwc.shape
    xp = jnp.pad(x_nhwc, ((0, 0), (PAD, PAD), (PAD, PAD), (0, 0)))
    ho = (h + 2 * PAD - K_SIZE) // STRIDE + 1
    wo = (w + 2 * PAD - K_SIZE) // STRIDE + 1
    cols = []
    for ky in range(K_SIZE):
        for kx in range(K_SIZE):
            cols.append(jax.lax.slice(
                xp, (0, ky, kx, 0),
                (n, ky + STRIDE * (ho - 1) + 1, kx + STRIDE * (wo - 1) + 1, c),
                (1, STRIDE, STRIDE, 1)))
    patches = jnp.stack(cols, axis=3)          # (N, Ho, Wo, 16, C)
    return patches.reshape(n * ho * wo, KK * c)


def discriminator_forward(packed, x_nchw):
    n, _, h, w = x_nchw.shape
    assert n * COUT4 <= LANES, "lane-packed output supports batch*64 <= 128"
    x = x_nchw.reshape(n, h, w, 1).astype(jnp.float32)  # NCHW->NHWC is a reshape (C=1)
    p1 = _im2col_1ch(x).astype(jnp.bfloat16)            # (N*Ho*Wo, 16)

    args = (p1, packed["w1"], packed["gb1"],
            packed["gth2"], packed["w2"], packed["gb2"],
            packed["gth3"], packed["w3"], packed["gb3"],
            packed["gth4"], packed["w4"], packed["b4"])
    out = pl.pallas_call(
        _disc_kernel,
        out_shape=jax.ShapeDtypeStruct((1, n * COUT4), jnp.float32),
        in_specs=[pl.BlockSpec(memory_space=pltpu.MemorySpace.VMEM) for _ in args],
        out_specs=pl.BlockSpec(memory_space=pltpu.MemorySpace.VMEM),
        compiler_params=pltpu.CompilerParams(vmem_limit_bytes=32 * 1024 * 1024),
    )(*args)
    # Lanes are already (sample-major, channel) == (N, 64, 1, 1).view(-1) ordering.
    return out.reshape(-1)


# ---------------------------------------------------------------------------
# Parameters (deterministic synthetic init) and pure-JAX reference
# ---------------------------------------------------------------------------
def init_params(key):
    ks = jax.random.split(key, 11)

    def conv_w(k, cout, cin):
        return 0.02 * jax.random.normal(k, (cout, cin, K_SIZE, K_SIZE), jnp.float32)

    return {
        "w1": conv_w(ks[0], 8, 1),
        "g1": 1.0 + 0.1 * jax.random.normal(ks[1], (8,), jnp.float32),
        "b1": 0.1 * jax.random.normal(ks[2], (8,), jnp.float32),
        "w2": conv_w(ks[3], 16, 8),
        "g2": 1.0 + 0.1 * jax.random.normal(ks[4], (16,), jnp.float32),
        "b2": 0.1 * jax.random.normal(ks[5], (16,), jnp.float32),
        "w3": conv_w(ks[6], 32, 16),
        "g3": 1.0 + 0.1 * jax.random.normal(ks[7], (32,), jnp.float32),
        "b3": 0.1 * jax.random.normal(ks[8], (32,), jnp.float32),
        "w4": conv_w(ks[9], 64, 32),
        "bias4": 0.1 * jax.random.normal(ks[10], (64,), jnp.float32),
    }


def reference_forward(params, x_nchw):
    def conv(x, w):
        return jax.lax.conv_general_dilated(
            x, w, window_strides=(STRIDE, STRIDE),
            padding=((PAD, PAD), (PAD, PAD)),
            dimension_numbers=("NCHW", "OIHW", "NCHW"))

    def bn_lrelu(y, g, b):
        mean = jnp.mean(y, axis=(0, 2, 3), keepdims=True)
        var = jnp.mean(jnp.square(y - mean), axis=(0, 2, 3), keepdims=True)
        z = (y - mean) * jax.lax.rsqrt(var + BN_EPS)
        z = z * g.reshape(1, -1, 1, 1) + b.reshape(1, -1, 1, 1)
        return jnp.where(z > 0, z, LRELU_SLOPE * z)

    x = bn_lrelu(conv(x_nchw, params["w1"]), params["g1"], params["b1"])
    x = bn_lrelu(conv(x, params["w2"]), params["g2"], params["b2"])
    x = bn_lrelu(conv(x, params["w3"]), params["g3"], params["b3"])
    x = conv(x, params["w4"]) + params["bias4"].reshape(1, -1, 1, 1)
    return jax.nn.sigmoid(x).reshape(-1)


if __name__ == "__main__":
    key = jax.random.PRNGKey(0)
    k_param, k_x = jax.random.split(key)
    params = init_params(k_param)

    # DCGAN-style input: batch=2, 1 channel, 16x16 (16 -> 8 -> 4 -> 2 -> 1).
    batch, image_hw = 2, 16
    x = jax.random.normal(k_x, (batch, 1, image_hw, image_hw), jnp.float32)

    packed = pack_params(params, image_hw)   # one-time, batch-independent packing

    fwd = jax.jit(discriminator_forward)
    out = jax.block_until_ready(fwd(packed, x))
    ref = jax.block_until_ready(reference_forward(params, x))

    assert out.shape == (batch * COUT4,), f"unexpected output shape {out.shape}"
    # bf16 MXU operands vs. fp32 reference -> loosened tolerance (expected precision loss).
    err = float(jnp.max(jnp.abs(out - ref)))
    assert err < 5e-2, f"mismatch vs pure-JAX reference (max abs err {err})"

    print("KERNEL_OK")
</pallas_src>

<mosaic_0001>
module attributes {stable_mosaic.version = 11 : i64} {
  func.func @_disc_kernel(%arg0: memref<128x16xbf16, #tpu.memory_space<vmem>>, %arg1: memref<16x128xbf16, #tpu.memory_space<vmem>>, %arg2: memref<2x128xf32, #tpu.memory_space<vmem>>, %arg3: memref<256x64xbf16, #tpu.memory_space<vmem>>, %arg4: memref<128x128xbf16, #tpu.memory_space<vmem>>, %arg5: memref<2x128xf32, #tpu.memory_space<vmem>>, %arg6: memref<64x16xbf16, #tpu.memory_space<vmem>>, %arg7: memref<256x128xbf16, #tpu.memory_space<vmem>>, %arg8: memref<2x128xf32, #tpu.memory_space<vmem>>, %arg9: memref<16x4xbf16, #tpu.memory_space<vmem>>, %arg10: memref<512x128xbf16, #tpu.memory_space<vmem>>, %arg11: memref<1x128xf32, #tpu.memory_space<vmem>>, %arg12: memref<1x128xf32, #tpu.memory_space<vmem>>) attributes {dimension_semantics = [], scalar_prefetch = 0 : i64, scratch_operands = 0 : i64, tpu.core_type = #tpu.core_type<tc>} {
    %c0 = arith.constant 0 : index
    %c0_0 = arith.constant 0 : index
    %0 = vector.load %arg0[%c0, %c0_0] : memref<128x16xbf16, #tpu.memory_space<vmem>>, vector<128x16xbf16>
    %c0_1 = arith.constant 0 : index
    %c0_2 = arith.constant 0 : index
    %1 = vector.load %arg1[%c0_1, %c0_2] : memref<16x128xbf16, #tpu.memory_space<vmem>>, vector<16x128xbf16>
    %cst = arith.constant dense<0.000000e+00> : vector<128x128xf32>
    %2 = tpu.matmul %0, %1, %cst {dimension_numbers = #tpu.dot_dimension_numbers<[1], [0], [0], [1], [0, 0, 1, 1], [], []>} : vector<128x16xbf16>, vector<16x128xbf16>, vector<128x128xf32> -> vector<128x128xf32>
    %c0_3 = arith.constant 0 : index
    %c0_4 = arith.constant 0 : index
    %3 = vector.load %arg2[%c0_3, %c0_4] : memref<2x128xf32, #tpu.memory_space<vmem>>, vector<2x128xf32>
    %4 = vector.extract_strided_slice %3 {offsets = [0, 0], sizes = [1, 128], strides = [1, 1]} : vector<2x128xf32> to vector<1x128xf32>
    %5 = vector.extract_strided_slice %3 {offsets = [1, 0], sizes = [1, 128], strides = [1, 1]} : vector<2x128xf32> to vector<1x128xf32>
    %cst_5 = arith.constant dense<0.000000e+00> : vector<128xf32>
    %6 = vector.multi_reduction <add>, %2, %cst_5 [0] : vector<128x128xf32> to vector<128xf32>
    %7 = vector.shape_cast %6 : vector<128xf32> to vector<1x128xf32>
    %8 = arith.mulf %2, %2 : vector<128x128xf32>
    %cst_6 = arith.constant dense<0.000000e+00> : vector<128xf32>
    %9 = vector.multi_reduction <add>, %8, %cst_6 [0] : vector<128x128xf32> to vector<128xf32>
    %10 = vector.shape_cast %9 : vector<128xf32> to vector<1x128xf32>
    %cst_7 = arith.constant 7.812500e-03 : f32
    %11 = vector.broadcast %cst_7 : f32 to vector<1x128xf32>
    %12 = arith.mulf %7, %11 : vector<1x128xf32>
    %cst_8 = arith.constant 7.812500e-03 : f32
    %13 = vector.broadcast %cst_8 : f32 to vector<1x128xf32>
    %14 = arith.mulf %10, %13 : vector<1x128xf32>
    %15 = arith.mulf %12, %12 : vector<1x128xf32>
    %16 = arith.subf %14, %15 : vector<1x128xf32>
    %cst_9 = arith.constant 0.000000e+00 : f32
    %17 = vector.broadcast %cst_9 : f32 to vector<1x128xf32>
    %18 = arith.maximumf %16, %17 : vector<1x128xf32>
    %cst_10 = arith.constant 9.99999974E-6 : f32
    %19 = vector.broadcast %cst_10 : f32 to vector<1x128xf32>
    %20 = arith.addf %18, %19 : vector<1x128xf32>
    %21 = math.rsqrt %20 : vector<1x128xf32>
    %22 = arith.mulf %4, %21 : vector<1x128xf32>
    %23 = arith.mulf %12, %22 : vector<1x128xf32>
    %24 = arith.subf %5, %23 : vector<1x128xf32>
    %25 = vector.broadcast %22 : vector<1x128xf32> to vector<128x128xf32>
    %26 = arith.mulf %2, %25 : vector<128x128xf32>
    %27 = vector.broadcast %24 : vector<1x128xf32> to vector<128x128xf32>
    %28 = arith.addf %26, %27 : vector<128x128xf32>
    %cst_11 = arith.constant 0.000000e+00 : f32
    %29 = vector.broadcast %cst_11 : f32 to vector<128x128xf32>
    %30 = arith.cmpf ogt, %28, %29 : vector<128x128xf32>
    %cst_12 = arith.constant 2.000000e-01 : f32
    %31 = vector.broadcast %cst_12 : f32 to vector<128x128xf32>
    %32 = arith.mulf %31, %28 : vector<128x128xf32>
    %33 = arith.select %30, %28, %32 : vector<128x128xi1>, vector<128x128xf32>
    %34 = arith.truncf %33 : vector<128x128xf32> to vector<128x128xbf16>
    %c0_13 = arith.constant 0 : index
    %c0_14 = arith.constant 0 : index
    %35 = vector.load %arg3[%c0_13, %c0_14] : memref<256x64xbf16, #tpu.memory_space<vmem>>, vector<256x64xbf16>
    %36 = vector.extract_strided_slice %34 {offsets = [0, 0], sizes = [64, 128], strides = [1, 1]} : vector<128x128xbf16> to vector<64x128xbf16>
    %cst_15 = arith.constant dense<0.000000e+00> : vector<256x128xf32>
    %37 = tpu.matmul %35, %36, %cst_15 {dimension_numbers = #tpu.dot_dimension_numbers<[1], [0], [0], [1], [0, 0, 1, 1], [], []>} : vector<256x64xbf16>, vector<64x128xbf16>, vector<256x128xf32> -> vector<256x128xf32>
    %38 = vector.extract_strided_slice %37 {offsets = [0, 0], sizes = [16, 128], strides = [1, 1]} : vector<256x128xf32> to vector<16x128xf32>
    %39 = vector.extract_strided_slice %37 {offsets = [16, 0], sizes = [16, 128], strides = [1, 1]} : vector<256x128xf32> to vector<16x128xf32>
    %c8_i32 = arith.constant 8 : i32
    %40 = tpu.dynamic_rotate %39 by %c8_i32 dim 1 : vector<16x128xf32>, i32 -> vector<16x128xf32>
    %41 = arith.addf %38, %40 : vector<16x128xf32>
    %42 = vector.extract_strided_slice %37 {offsets = [32, 0], sizes = [16, 128], strides = [1, 1]} : vector<256x128xf32> to vector<16x128xf32>
    %c16_i32 = arith.constant 16 : i32
    %43 = tpu.dynamic_rotate %42 by %c16_i32 dim 1 : vector<16x128xf32>, i32 -> vector<16x128xf32>
    %44 = arith.addf %41, %43 : vector<16x128xf32>
    %45 = vector.extract_strided_slice %37 {offsets = [48, 0], sizes = [16, 128], strides = [1, 1]} : vector<256x128xf32> to vector<16x128xf32>
    %c24_i32 = arith.constant 24 : i32
    %46 = tpu.dynamic_rotate %45 by %c24_i32 dim 1 : vector<16x128xf32>, i32 -> vector<16x128xf32>
    %47 = arith.addf %44, %46 : vector<16x128xf32>
    %48 = vector.extract_strided_slice %37 {offsets = [64, 0], sizes = [16, 128], strides = [1, 1]} : vector<256x128xf32> to vector<16x128xf32>
    %c32_i32 = arith.constant 32 : i32
    %49 = tpu.dynamic_rotate %48 by %c32_i32 dim 1 : vector<16x128xf32>, i32 -> vector<16x128xf32>
    %50 = arith.addf %47, %49 : vector<16x128xf32>
    %51 = vector.extract_strided_slice %37 {offsets = [80, 0], sizes = [16, 128], strides = [1, 1]} : vector<256x128xf32> to vector<16x128xf32>
    %c40_i32 = arith.constant 40 : i32
    %52 = tpu.dynamic_rotate %51 by %c40_i32 dim 1 : vector<16x128xf32>, i32 -> vector<16x128xf32>
    %53 = arith.addf %50, %52 : vector<16x128xf32>
    %54 = vector.extract_strided_slice %37 {offsets = [96, 0], sizes = [16, 128], strides = [1, 1]} : vector<256x128xf32> to vector<16x128xf32>
    %c48_i32 = arith.constant 48 : i32
    %55 = tpu.dynamic_rotate %54 by %c48_i32 dim 1 : vector<16x128xf32>, i32 -> vector<16x128xf32>
    %56 = arith.addf %53, %55 : vector<16x128xf32>
    %57 = vector.extract_strided_slice %37 {offsets = [112, 0], sizes = [16, 128], strides = [1, 1]} : vector<256x128xf32> to vector<16x128xf32>
    %c56_i32 = arith.constant 56 : i32
    %58 = tpu.dynamic_rotate %57 by %c56_i32 dim 1 : vector<16x128xf32>, i32 -> vector<16x128xf32>
    %59 = arith.addf %56, %58 : vector<16x128xf32>
    %60 = vector.extract_strided_slice %37 {offsets = [128, 0], sizes = [16, 128], strides = [1, 1]} : vector<256x128xf32> to vector<16x128xf32>
    %c64_i32 = arith.constant 64 : i32
    %61 = tpu.dynamic_rotate %60 by %c64_i32 dim 1 : vector<16x128xf32>, i32 -> vector<16x128xf32>
    %62 = arith.addf %59, %61 : vector<16x128xf32>
    %63 = vector.extract_strided_slice %37 {offsets = [144, 0], sizes = [16, 128], strides = [1, 1]} : vector<256x128xf32> to vector<16x128xf32>
    %c72_i32 = arith.constant 72 : i32
    %64 = tpu.dynamic_rotate %63 by %c72_i32 dim 1 : vector<16x128xf32>, i32 -> vector<16x128xf32>
    %65 = arith.addf %62, %64 : vector<16x128xf32>
    %66 = vector.extract_strided_slice %37 {offsets = [160, 0], sizes = [16, 128], strides = [1, 1]} : vector<256x128xf32> to vector<16x128xf32>
    %c80_i32 = arith.constant 80 : i32
    %67 = tpu.dynamic_rotate %66 by %c80_i32 dim 1 : vector<16x128xf32>, i32 -> vector<16x128xf32>
    %68 = arith.addf %65, %67 : vector<16x128xf32>
    %69 = vector.extract_strided_slice %37 {offsets = [176, 0], sizes = [16, 128], strides = [1, 1]} : vector<256x128xf32> to vector<16x128xf32>
    %c88_i32 = arith.constant 88 : i32
    %70 = tpu.dynamic_rotate %69 by %c88_i32 dim 1 : vector<16x128xf32>, i32 -> vector<16x128xf32>
    %71 = arith.addf %68, %70 : vector<16x128xf32>
    %72 = vector.extract_strided_slice %37 {offsets = [192, 0], sizes = [16, 128], strides = [1, 1]} : vector<256x128xf32> to vector<16x128xf32>
    %c96_i32 = arith.constant 96 : i32
    %73 = tpu.dynamic_rotate %72 by %c96_i32 dim 1 : vector<16x128xf32>, i32 -> vector<16x128xf32>
    %74 = arith.addf %71, %73 : vector<16x128xf32>
    %75 = vector.extract_strided_slice %37 {offsets = [208, 0], sizes = [16, 128], strides = [1, 1]} : vector<256x128xf32> to vector<16x128xf32>
    %c104_i32 = arith.constant 104 : i32
    %76 = tpu.dynamic_rotate %75 by %c104_i32 dim 1 : vector<16x128xf32>, i32 -> vector<16x128xf32>
    %77 = arith.addf %74, %76 : vector<16x128xf32>
    %78 = vector.extract_strided_slice %37 {offsets = [224, 0], sizes = [16, 128], strides = [1, 1]} : vector<256x128xf32> to vector<16x128xf32>
    %c112_i32 = arith.constant 112 : i32
    %79 = tpu.dynamic_rotate %78 by %c112_i32 dim 1 : vector<16x128xf32>, i32 -> vector<16x128xf32>
    %80 = arith.addf %77, %79 : vector<16x128xf32>
    %81 = vector.extract_strided_slice %37 {offsets = [240, 0], sizes = [16, 128], strides = [1, 1]} : vector<256x128xf32> to vector<16x128xf32>
    %c120_i32 = arith.constant 120 : i32
    %82 = tpu.dynamic_rotate %81 by %c120_i32 dim 1 : vector<16x128xf32>, i32 -> vector<16x128xf32>
    %83 = arith.addf %80, %82 : vector<16x128xf32>
    %84 = vector.extract_strided_slice %34 {offsets = [64, 0], sizes = [64, 128], strides = [1, 1]} : vector<128x128xbf16> to vector<64x128xbf16>
    %cst_16 = arith.constant dense<0.000000e+00> : vector<256x128xf32>
    %85 = tpu.matmul %35, %84, %cst_16 {dimension_numbers = #tpu.dot_dimension_numbers<[1], [0], [0], [1], [0, 0, 1, 1], [], []>} : vector<256x64xbf16>, vector<64x128xbf16>, vector<256x128xf32> -> vector<256x128xf32>
    %86 = vector.extract_strided_slice %85 {offsets = [0, 0], sizes = [16, 128], strides = [1, 1]} : vector<256x128xf32> to vector<16x128xf32>
    %87 = vector.extract_strided_slice %85 {offsets = [16, 0], sizes = [16, 128], strides = [1, 1]} : vector<256x128xf32> to vector<16x128xf32>
    %c8_i32_17 = arith.constant 8 : i32
    %88 = tpu.dynamic_rotate %87 by %c8_i32_17 dim 1 : vector<16x128xf32>, i32 -> vector<16x128xf32>
    %89 = arith.addf %86, %88 : vector<16x128xf32>
    %90 = vector.extract_strided_slice %85 {offsets = [32, 0], sizes = [16, 128], strides = [1, 1]} : vector<256x128xf32> to vector<16x128xf32>
    %c16_i32_18 = arith.constant 16 : i32
    %91 = tpu.dynamic_rotate %90 by %c16_i32_18 dim 1 : vector<16x128xf32>, i32 -> vector<16x128xf32>
    %92 = arith.addf %89, %91 : vector<16x128xf32>
    %93 = vector.extract_strided_slice %85 {offsets = [48, 0], sizes = [16, 128], strides = [1, 1]} : vector<256x128xf32> to vector<16x128xf32>
    %c24_i32_19 = arith.constant 24 : i32
    %94 = tpu.dynamic_rotate %93 by %c24_i32_19 dim 1 : vector<16x128xf32>, i32 -> vector<16x128xf32>
    %95 = arith.addf %92, %94 : vector<16x128xf32>
    %96 = vector.extract_strided_slice %85 {offsets = [64, 0], sizes = [16, 128], strides = [1, 1]} : vector<256x128xf32> to vector<16x128xf32>
    %c32_i32_20 = arith.constant 32 : i32
    %97 = tpu.dynamic_rotate %96 by %c32_i32_20 dim 1 : vector<16x128xf32>, i32 -> vector<16x128xf32>
    %98 = arith.addf %95, %97 : vector<16x128xf32>
    %99 = vector.extract_strided_slice %85 {offsets = [80, 0], sizes = [16, 128], strides = [1, 1]} : vector<256x128xf32> to vector<16x128xf32>
    %c40_i32_21 = arith.constant 40 : i32
    %100 = tpu.dynamic_rotate %99 by %c40_i32_21 dim 1 : vector<16x128xf32>, i32 -> vector<16x128xf32>
    %101 = arith.addf %98, %100 : vector<16x128xf32>
    %102 = vector.extract_strided_slice %85 {offsets = [96, 0], sizes = [16, 128], strides = [1, 1]} : vector<256x128xf32> to vector<16x128xf32>
    %c48_i32_22 = arith.constant 48 : i32
    %103 = tpu.dynamic_rotate %102 by %c48_i32_22 dim 1 : vector<16x128xf32>, i32 -> vector<16x128xf32>
    %104 = arith.addf %101, %103 : vector<16x128xf32>
    %105 = vector.extract_strided_slice %85 {offsets = [112, 0], sizes = [16, 128], strides = [1, 1]} : vector<256x128xf32> to vector<16x128xf32>
    %c56_i32_23 = arith.constant 56 : i32
    %106 = tpu.dynamic_rotate %105 by %c56_i32_23 dim 1 : vector<16x128xf32>, i32 -> vector<16x128xf32>
    %107 = arith.addf %104, %106 : vector<16x128xf32>
    %108 = vector.extract_strided_slice %85 {offsets = [128, 0], sizes = [16, 128], strides = [1, 1]} : vector<256x128xf32> to vector<16x128xf32>
    %c64_i32_24 = arith.constant 64 : i32
    %109 = tpu.dynamic_rotate %108 by %c64_i32_24 dim 1 : vector<16x128xf32>, i32 -> vector<16x128xf32>
    %110 = arith.addf %107, %109 : vector<16x128xf32>
    %111 = vector.extract_strided_slice %85 {offsets = [144, 0], sizes = [16, 128], strides = [1, 1]} : vector<256x128xf32> to vector<16x128xf32>
    %c72_i32_25 = arith.constant 72 : i32
    %112 = tpu.dynamic_rotate %111 by %c72_i32_25 dim 1 : vector<16x128xf32>, i32 -> vector<16x128xf32>
    %113 = arith.addf %110, %112 : vector<16x128xf32>
    %114 = vector.extract_strided_slice %85 {offsets = [160, 0], sizes = [16, 128], strides = [1, 1]} : vector<256x128xf32> to vector<16x128xf32>
    %c80_i32_26 = arith.constant 80 : i32
    %115 = tpu.dynamic_rotate %114 by %c80_i32_26 dim 1 : vector<16x128xf32>, i32 -> vector<16x128xf32>
    %116 = arith.addf %113, %115 : vector<16x128xf32>
    %117 = vector.extract_strided_slice %85 {offsets = [176, 0], sizes = [16, 128], strides = [1, 1]} : vector<256x128xf32> to vector<16x128xf32>
    %c88_i32_27 = arith.constant 88 : i32
    %118 = tpu.dynamic_rotate %117 by %c88_i32_27 dim 1 : vector<16x128xf32>, i32 -> vector<16x128xf32>
    %119 = arith.addf %116, %118 : vector<16x128xf32>
    %120 = vector.extract_strided_slice %85 {offsets = [192, 0], sizes = [16, 128], strides = [1, 1]} : vector<256x128xf32> to vector<16x128xf32>
    %c96_i32_28 = arith.constant 96 : i32
    %121 = tpu.dynamic_rotate %120 by %c96_i32_28 dim 1 : vector<16x128xf32>, i32 -> vector<16x128xf32>
    %122 = arith.addf %119, %121 : vector<16x128xf32>
    %123 = vector.extract_strided_slice %85 {offsets = [208, 0], sizes = [16, 128], strides = [1, 1]} : vector<256x128xf32> to vector<16x128xf32>
    %c104_i32_29 = arith.constant 104 : i32
    %124 = tpu.dynamic_rotate %123 by %c104_i32_29 dim 1 : vector<16x128xf32>, i32 -> vector<16x128xf32>
    %125 = arith.addf %122, %124 : vector<16x128xf32>
    %126 = vector.extract_strided_slice %85 {offsets = [224, 0], sizes = [16, 128], strides = [1, 1]} : vector<256x128xf32> to vector<16x128xf32>
    %c112_i32_30 = arith.constant 112 : i32
    %127 = tpu.dynamic_rotate %126 by %c112_i32_30 dim 1 : vector<16x128xf32>, i32 -> vector<16x128xf32>
    %128 = arith.addf %125, %127 : vector<16x128xf32>
    %129 = vector.extract_strided_slice %85 {offsets = [240, 0], sizes = [16, 128], strides = [1, 1]} : vector<256x128xf32> to vector<16x128xf32>
    %c120_i32_31 = arith.constant 120 : i32
    %130 = tpu.dynamic_rotate %129 by %c120_i32_31 dim 1 : vector<16x128xf32>, i32 -> vector<16x128xf32>
    %131 = arith.addf %128, %130 : vector<16x128xf32>
    %132 = tpu.concatenate %83, %131 in 0 : vector<16x128xf32>, vector<16x128xf32> -> vector<32x128xf32>
    %133 = arith.truncf %132 : vector<32x128xf32> to vector<32x128xbf16>
    %c0_32 = arith.constant 0 : index
    %c0_33 = arith.constant 0 : index
    %134 = vector.load %arg4[%c0_32, %c0_33] : memref<128x128xbf16, #tpu.memory_space<vmem>>, vector<128x128xbf16>
    %cst_34 = arith.constant dense<0.000000e+00> : vector<32x128xf32>
    %135 = tpu.matmul %133, %134, %cst_34 {dimension_numbers = #tpu.dot_dimension_numbers<[1], [0], [0], [1], [0, 0, 1, 1], [], []>} : vector<32x128xbf16>, vector<128x128xbf16>, vector<32x128xf32> -> vector<32x128xf32>
    %c0_35 = arith.constant 0 : index
    %c0_36 = arith.constant 0 : index
    %136 = vector.load %arg5[%c0_35, %c0_36] : memref<2x128xf32, #tpu.memory_space<vmem>>, vector<2x128xf32>
    %137 = vector.extract_strided_slice %136 {offsets = [0, 0], sizes = [1, 128], strides = [1, 1]} : vector<2x128xf32> to vector<1x128xf32>
    %138 = vector.extract_strided_slice %136 {offsets = [1, 0], sizes = [1, 128], strides = [1, 1]} : vector<2x128xf32> to vector<1x128xf32>
    %cst_37 = arith.constant dense<0.000000e+00> : vector<128xf32>
    %139 = vector.multi_reduction <add>, %135, %cst_37 [0] : vector<32x128xf32> to vector<128xf32>
    %140 = vector.shape_cast %139 : vector<128xf32> to vector<1x128xf32>
    %141 = arith.mulf %135, %135 : vector<32x128xf32>
    %cst_38 = arith.constant dense<0.000000e+00> : vector<128xf32>
    %142 = vector.multi_reduction <add>, %141, %cst_38 [0] : vector<32x128xf32> to vector<128xf32>
    %143 = vector.shape_cast %142 : vector<128xf32> to vector<1x128xf32>
    %cst_39 = arith.constant 3.125000e-02 : f32
    %144 = vector.broadcast %cst_39 : f32 to vector<1x128xf32>
    %145 = arith.mulf %140, %144 : vector<1x128xf32>
    %cst_40 = arith.constant 3.125000e-02 : f32
    %146 = vector.broadcast %cst_40 : f32 to vector<1x128xf32>
    %147 = arith.mulf %143, %146 : vector<1x128xf32>
    %148 = arith.mulf %145, %145 : vector<1x128xf32>
    %149 = arith.subf %147, %148 : vector<1x128xf32>
    %cst_41 = arith.constant 0.000000e+00 : f32
    %150 = vector.broadcast %cst_41 : f32 to vector<1x128xf32>
    %151 = arith.maximumf %149, %150 : vector<1x128xf32>
    %cst_42 = arith.constant 9.99999974E-6 : f32
    %152 = vector.broadcast %cst_42 : f32 to vector<1x128xf32>
    %153 = arith.addf %151, %152 : vector<1x128xf32>
    %154 = math.rsqrt %153 : vector<1x128xf32>
    %155 = arith.mulf %137, %154 : vector<1x128xf32>
    %156 = arith.mulf %145, %155 : vector<1x128xf32>
    %157 = arith.subf %138, %156 : vector<1x128xf32>
    %158 = vector.broadcast %155 : vector<1x128xf32> to vector<32x128xf32>
    %159 = arith.mulf %135, %158 : vector<32x128xf32>
    %160 = vector.broadcast %157 : vector<1x128xf32> to vector<32x128xf32>
    %161 = arith.addf %159, %160 : vector<32x128xf32>
    %cst_43 = arith.constant 0.000000e+00 : f32
    %162 = vector.broadcast %cst_43 : f32 to vector<32x128xf32>
    %163 = arith.cmpf ogt, %161, %162 : vector<32x128xf32>
    %cst_44 = arith.constant 2.000000e-01 : f32
    %164 = vector.broadcast %cst_44 : f32 to vector<32x128xf32>
    %165 = arith.mulf %164, %161 : vector<32x128xf32>
    %166 = arith.select %163, %161, %165 : vector<32x128xi1>, vector<32x128xf32>
    %167 = arith.truncf %166 : vector<32x128xf32> to vector<32x128xbf16>
    %c0_45 = arith.constant 0 : index
    %c0_46 = arith.constant 0 : index
    %168 = vector.load %arg6[%c0_45, %c0_46] : memref<64x16xbf16, #tpu.memory_space<vmem>>, vector<64x16xbf16>
    %169 = vector.extract_strided_slice %167 {offsets = [0, 0], sizes = [16, 128], strides = [1, 1]} : vector<32x128xbf16> to vector<16x128xbf16>
    %cst_47 = arith.constant dense<0.000000e+00> : vector<64x128xf32>
    %170 = tpu.matmul %168, %169, %cst_47 {dimension_numbers = #tpu.dot_dimension_numbers<[1], [0], [0], [1], [0, 0, 1, 1], [], []>} : vector<64x16xbf16>, vector<16x128xbf16>, vector<64x128xf32> -> vector<64x128xf32>
    %171 = vector.extract_strided_slice %170 {offsets = [0, 0], sizes = [4, 128], strides = [1, 1]} : vector<64x128xf32> to vector<4x128xf32>
    %172 = vector.extract_strided_slice %170 {offsets = [4, 0], sizes = [4, 128], strides = [1, 1]} : vector<64x128xf32> to vector<4x128xf32>
    %c16_i32_48 = arith.constant 16 : i32
    %173 = tpu.dynamic_rotate %172 by %c16_i32_48 dim 1 : vector<4x128xf32>, i32 -> vector<4x128xf32>
    %174 = arith.addf %171, %173 : vector<4x128xf32>
    %175 = vector.extract_strided_slice %170 {offsets = [8, 0], sizes = [4, 128], strides = [1, 1]} : vector<64x128xf32> to vector<4x128xf32>
    %c32_i32_49 = arith.constant 32 : i32
    %176 = tpu.dynamic_rotate %175 by %c32_i32_49 dim 1 : vector<4x128xf32>, i32 -> vector<4x128xf32>
    %177 = arith.addf %174, %176 : vector<4x128xf32>
    %178 = vector.extract_strided_slice %170 {offsets = [12, 0], sizes = [4, 128], strides = [1, 1]} : vector<64x128xf32> to vector<4x128xf32>
    %c48_i32_50 = arith.constant 48 : i32
    %179 = tpu.dynamic_rotate %178 by %c48_i32_50 dim 1 : vector<4x128xf32>, i32 -> vector<4x128xf32>
    %180 = arith.addf %177, %179 : vector<4x128xf32>
    %181 = vector.extract_strided_slice %170 {offsets = [16, 0], sizes = [4, 128], strides = [1, 1]} : vector<64x128xf32> to vector<4x128xf32>
    %c64_i32_51 = arith.constant 64 : i32
    %182 = tpu.dynamic_rotate %181 by %c64_i32_51 dim 1 : vector<4x128xf32>, i32 -> vector<4x128xf32>
    %183 = arith.addf %180, %182 : vector<4x128xf32>
    %184 = vector.extract_strided_slice %170 {offsets = [20, 0], sizes = [4, 128], strides = [1, 1]} : vector<64x128xf32> to vector<4x128xf32>
    %c80_i32_52 = arith.constant 80 : i32
    %185 = tpu.dynamic_rotate %184 by %c80_i32_52 dim 1 : vector<4x128xf32>, i32 -> vector<4x128xf32>
    %186 = arith.addf %183, %185 : vector<4x128xf32>
    %187 = vector.extract_strided_slice %170 {offsets = [24, 0], sizes = [4, 128], strides = [1, 1]} : vector<64x128xf32> to vector<4x128xf32>
    %c96_i32_53 = arith.constant 96 : i32
    %188 = tpu.dynamic_rotate %187 by %c96_i32_53 dim 1 : vector<4x128xf32>, i32 -> vector<4x128xf32>
    %189 = arith.addf %186, %188 : vector<4x128xf32>
    %190 = vector.extract_strided_slice %170 {offsets = [28, 0], sizes = [4, 128], strides = [1, 1]} : vector<64x128xf32> to vector<4x128xf32>
    %c112_i32_54 = arith.constant 112 : i32
    %191 = tpu.dynamic_rotate %190 by %c112_i32_54 dim 1 : vector<4x128xf32>, i32 -> vector<4x128xf32>
    %192 = arith.addf %189, %191 : vector<4x128xf32>
    %193 = vector.extract_strided_slice %170 {offsets = [32, 0], sizes = [4, 128], strides = [1, 1]} : vector<64x128xf32> to vector<4x128xf32>
    %194 = vector.extract_strided_slice %170 {offsets = [36, 0], sizes = [4, 128], strides = [1, 1]} : vector<64x128xf32> to vector<4x128xf32>
    %c16_i32_55 = arith.constant 16 : i32
    %195 = tpu.dynamic_rotate %194 by %c16_i32_55 dim 1 : vector<4x128xf32>, i32 -> vector<4x128xf32>
    %196 = arith.addf %193, %195 : vector<4x128xf32>
    %197 = vector.extract_strided_slice %170 {offsets = [40, 0], sizes = [4, 128], strides = [1, 1]} : vector<64x128xf32> to vector<4x128xf32>
    %c32_i32_56 = arith.constant 32 : i32
    %198 = tpu.dynamic_rotate %197 by %c32_i32_56 dim 1 : vector<4x128xf32>, i32 -> vector<4x128xf32>
    %199 = arith.addf %196, %198 : vector<4x128xf32>
    %200 = vector.extract_strided_slice %170 {offsets = [44, 0], sizes = [4, 128], strides = [1, 1]} : vector<64x128xf32> to vector<4x128xf32>
    %c48_i32_57 = arith.constant 48 : i32
    %201 = tpu.dynamic_rotate %200 by %c48_i32_57 dim 1 : vector<4x128xf32>, i32 -> vector<4x128xf32>
    %202 = arith.addf %199, %201 : vector<4x128xf32>
    %203 = vector.extract_strided_slice %170 {offsets = [48, 0], sizes = [4, 128], strides = [1, 1]} : vector<64x128xf32> to vector<4x128xf32>
    %c64_i32_58 = arith.constant 64 : i32
    %204 = tpu.dynamic_rotate %203 by %c64_i32_58 dim 1 : vector<4x128xf32>, i32 -> vector<4x128xf32>
    %205 = arith.addf %202, %204 : vector<4x128xf32>
    %206 = vector.extract_strided_slice %170 {offsets = [52, 0], sizes = [4, 128], strides = [1, 1]} : vector<64x128xf32> to vector<4x128xf32>
    %c80_i32_59 = arith.constant 80 : i32
    %207 = tpu.dynamic_rotate %206 by %c80_i32_59 dim 1 : vector<4x128xf32>, i32 -> vector<4x128xf32>
    %208 = arith.addf %205, %207 : vector<4x128xf32>
    %209 = vector.extract_strided_slice %170 {offsets = [56, 0], sizes = [4, 128], strides = [1, 1]} : vector<64x128xf32> to vector<4x128xf32>
    %c96_i32_60 = arith.constant 96 : i32
    %210 = tpu.dynamic_rotate %209 by %c96_i32_60 dim 1 : vector<4x128xf32>, i32 -> vector<4x128xf32>
    %211 = arith.addf %208, %210 : vector<4x128xf32>
    %212 = vector.extract_strided_slice %170 {offsets = [60, 0], sizes = [4, 128], strides = [1, 1]} : vector<64x128xf32> to vector<4x128xf32>
    %c112_i32_61 = arith.constant 112 : i32
    %213 = tpu.dynamic_rotate %212 by %c112_i32_61 dim 1 : vector<4x128xf32>, i32 -> vector<4x128xf32>
    %214 = arith.addf %211, %213 : vector<4x128xf32>
    %215 = tpu.concatenate %192, %214 in 1 : vector<4x128xf32>, vector<4x128xf32> -> vector<4x256xf32>
    %216 = vector.extract_strided_slice %167 {offsets = [16, 0], sizes = [16, 128], strides = [1, 1]} : vector<32x128xbf16> to vector<16x128xbf16>
    %cst_62 = arith.constant dense<0.000000e+00> : vector<64x128xf32>
    %217 = tpu.matmul %168, %216, %cst_62 {dimension_numbers = #tpu.dot_dimension_numbers<[1], [0], [0], [1], [0, 0, 1, 1], [], []>} : vector<64x16xbf16>, vector<16x128xbf16>, vector<64x128xf32> -> vector<64x128xf32>
    %218 = vector.extract_strided_slice %217 {offsets = [0, 0], sizes = [4, 128], strides = [1, 1]} : vector<64x128xf32> to vector<4x128xf32>
    %219 = vector.extract_strided_slice %217 {offsets = [4, 0], sizes = [4, 128], strides = [1, 1]} : vector<64x128xf32> to vector<4x128xf32>
    %c16_i32_63 = arith.constant 16 : i32
    %220 = tpu.dynamic_rotate %219 by %c16_i32_63 dim 1 : vector<4x128xf32>, i32 -> vector<4x128xf32>
    %221 = arith.addf %218, %220 : vector<4x128xf32>
    %222 = vector.extract_strided_slice %217 {offsets = [8, 0], sizes = [4, 128], strides = [1, 1]} : vector<64x128xf32> to vector<4x128xf32>
    %c32_i32_64 = arith.constant 32 : i32
    %223 = tpu.dynamic_rotate %222 by %c32_i32_64 dim 1 : vector<4x128xf32>, i32 -> vector<4x128xf32>
    %224 = arith.addf %221, %223 : vector<4x128xf32>
    %225 = vector.extract_strided_slice %217 {offsets = [12, 0], sizes = [4, 128], strides = [1, 1]} : vector<64x128xf32> to vector<4x128xf32>
    %c48_i32_65 = arith.constant 48 : i32
    %226 = tpu.dynamic_rotate %225 by %c48_i32_65 dim 1 : vector<4x128xf32>, i32 -> vector<4x128xf32>
    %227 = arith.addf %224, %226 : vector<4x128xf32>
    %228 = vector.extract_strided_slice %217 {offsets = [16, 0], sizes = [4, 128], strides = [1, 1]} : vector<64x128xf32> to vector<4x128xf32>
    %c64_i32_66 = arith.constant 64 : i32
    %229 = tpu.dynamic_rotate %228 by %c64_i32_66 dim 1 : vector<4x128xf32>, i32 -> vector<4x128xf32>
    %230 = arith.addf %227, %229 : vector<4x128xf32>
    %231 = vector.extract_strided_slice %217 {offsets = [20, 0], sizes = [4, 128], strides = [1, 1]} : vector<64x128xf32> to vector<4x128xf32>
    %c80_i32_67 = arith.constant 80 : i32
    %232 = tpu.dynamic_rotate %231 by %c80_i32_67 dim 1 : vector<4x128xf32>, i32 -> vector<4x128xf32>
    %233 = arith.addf %230, %232 : vector<4x128xf32>
    %234 = vector.extract_strided_slice %217 {offsets = [24, 0], sizes = [4, 128], strides = [1, 1]} : vector<64x128xf32> to vector<4x128xf32>
    %c96_i32_68 = arith.constant 96 : i32
    %235 = tpu.dynamic_rotate %234 by %c96_i32_68 dim 1 : vector<4x128xf32>, i32 -> vector<4x128xf32>
    %236 = arith.addf %233, %235 : vector<4x128xf32>
    %237 = vector.extract_strided_slice %217 {offsets = [28, 0], sizes = [4, 128], strides = [1, 1]} : vector<64x128xf32> to vector<4x128xf32>
    %c112_i32_69 = arith.constant 112 : i32
    %238 = tpu.dynamic_rotate %237 by %c112_i32_69 dim 1 : vector<4x128xf32>, i32 -> vector<4x128xf32>
    %239 = arith.addf %236, %238 : vector<4x128xf32>
    %240 = vector.extract_strided_slice %217 {offsets = [32, 0], sizes = [4, 128], strides = [1, 1]} : vector<64x128xf32> to vector<4x128xf32>
    %241 = vector.extract_strided_slice %217 {offsets = [36, 0], sizes = [4, 128], strides = [1, 1]} : vector<64x128xf32> to vector<4x128xf32>
    %c16_i32_70 = arith.constant 16 : i32
    %242 = tpu.dynamic_rotate %241 by %c16_i32_70 dim 1 : vector<4x128xf32>, i32 -> vector<4x128xf32>
    %243 = arith.addf %240, %242 : vector<4x128xf32>
    %244 = vector.extract_strided_slice %217 {offsets = [40, 0], sizes = [4, 128], strides = [1, 1]} : vector<64x128xf32> to vector<4x128xf32>
    %c32_i32_71 = arith.constant 32 : i32
    %245 = tpu.dynamic_rotate %244 by %c32_i32_71 dim 1 : vector<4x128xf32>, i32 -> vector<4x128xf32>
    %246 = arith.addf %243, %245 : vector<4x128xf32>
    %247 = vector.extract_strided_slice %217 {offsets = [44, 0], sizes = [4, 128], strides = [1, 1]} : vector<64x128xf32> to vector<4x128xf32>
    %c48_i32_72 = arith.constant 48 : i32
    %248 = tpu.dynamic_rotate %247 by %c48_i32_72 dim 1 : vector<4x128xf32>, i32 -> vector<4x128xf32>
    %249 = arith.addf %246, %248 : vector<4x128xf32>
    %250 = vector.extract_strided_slice %217 {offsets = [48, 0], sizes = [4, 128], strides = [1, 1]} : vector<64x128xf32> to vector<4x128xf32>
    %c64_i32_73 = arith.constant 64 : i32
    %251 = tpu.dynamic_rotate %250 by %c64_i32_73 dim 1 : vector<4x128xf32>, i32 -> vector<4x128xf32>
    %252 = arith.addf %249, %251 : vector<4x128xf32>
    %253 = vector.extract_strided_slice %217 {offsets = [52, 0], sizes = [4, 128], strides = [1, 1]} : vector<64x128xf32> to vector<4x128xf32>
    %c80_i32_74 = arith.constant 80 : i32
    %254 = tpu.dynamic_rotate %253 by %c80_i32_74 dim 1 : vector<4x128xf32>, i32 -> vector<4x128xf32>
    %255 = arith.addf %252, %254 : vector<4x128xf32>
    %256 = vector.extract_strided_slice %217 {offsets = [56, 0], sizes = [4, 128], strides = [1, 1]} : vector<64x128xf32> to vector<4x128xf32>
    %c96_i32_75 = arith.constant 96 : i32
    %257 = tpu.dynamic_rotate %256 by %c96_i32_75 dim 1 : vector<4x128xf32>, i32 -> vector<4x128xf32>
    %258 = arith.addf %255, %257 : vector<4x128xf32>
    %259 = vector.extract_strided_slice %217 {offsets = [60, 0], sizes = [4, 128], strides = [1, 1]} : vector<64x128xf32> to vector<4x128xf32>
    %c112_i32_76 = arith.constant 112 : i32
    %260 = tpu.dynamic_rotate %259 by %c112_i32_76 dim 1 : vector<4x128xf32>, i32 -> vector<4x128xf32>
    %261 = arith.addf %258, %260 : vector<4x128xf32>
    %262 = tpu.concatenate %239, %261 in 1 : vector<4x128xf32>, vector<4x128xf32> -> vector<4x256xf32>
    %263 = tpu.concatenate %215, %262 in 0 : vector<4x256xf32>, vector<4x256xf32> -> vector<8x256xf32>
    %264 = arith.truncf %263 : vector<8x256xf32> to vector<8x256xbf16>
    %c0_77 = arith.constant 0 : index
    %c0_78 = arith.constant 0 : index
    %265 = vector.load %arg7[%c0_77, %c0_78] : memref<256x128xbf16, #tpu.memory_space<vmem>>, vector<256x128xbf16>
    %cst_79 = arith.constant dense<0.000000e+00> : vector<8x128xf32>
    %266 = tpu.matmul %264, %265, %cst_79 {dimension_numbers = #tpu.dot_dimension_numbers<[1], [0], [0], [1], [0, 0, 1, 1], [], []>} : vector<8x256xbf16>, vector<256x128xbf16>, vector<8x128xf32> -> vector<8x128xf32>
    %c0_80 = arith.constant 0 : index
    %c0_81 = arith.constant 0 : index
    %267 = vector.load %arg8[%c0_80, %c0_81] : memref<2x128xf32, #tpu.memory_space<vmem>>, vector<2x128xf32>
    %268 = vector.extract_strided_slice %267 {offsets = [0, 0], sizes = [1, 128], strides = [1, 1]} : vector<2x128xf32> to vector<1x128xf32>
    %269 = vector.extract_strided_slice %267 {offsets = [1, 0], sizes = [1, 128], strides = [1, 1]} : vector<2x128xf32> to vector<1x128xf32>
    %cst_82 = arith.constant dense<0.000000e+00> : vector<128xf32>
    %270 = vector.multi_reduction <add>, %266, %cst_82 [0] : vector<8x128xf32> to vector<128xf32>
    %271 = vector.shape_cast %270 : vector<128xf32> to vector<1x128xf32>
    %272 = arith.mulf %266, %266 : vector<8x128xf32>
    %cst_83 = arith.constant dense<0.000000e+00> : vector<128xf32>
    %273 = vector.multi_reduction <add>, %272, %cst_83 [0] : vector<8x128xf32> to vector<128xf32>
    %274 = vector.shape_cast %273 : vector<128xf32> to vector<1x128xf32>
    %cst_84 = arith.constant 1.250000e-01 : f32
    %275 = vector.broadcast %cst_84 : f32 to vector<1x128xf32>
    %276 = arith.mulf %271, %275 : vector<1x128xf32>
    %cst_85 = arith.constant 1.250000e-01 : f32
    %277 = vector.broadcast %cst_85 : f32 to vector<1x128xf32>
    %278 = arith.mulf %274, %277 : vector<1x128xf32>
    %279 = arith.mulf %276, %276 : vector<1x128xf32>
    %280 = arith.subf %278, %279 : vector<1x128xf32>
    %cst_86 = arith.constant 0.000000e+00 : f32
    %281 = vector.broadcast %cst_86 : f32 to vector<1x128xf32>
    %282 = arith.maximumf %280, %281 : vector<1x128xf32>
    %cst_87 = arith.constant 9.99999974E-6 : f32
    %283 = vector.broadcast %cst_87 : f32 to vector<1x128xf32>
    %284 = arith.addf %282, %283 : vector<1x128xf32>
    %285 = math.rsqrt %284 : vector<1x128xf32>
    %286 = arith.mulf %268, %285 : vector<1x128xf32>
    %287 = arith.mulf %276, %286 : vector<1x128xf32>
    %288 = arith.subf %269, %287 : vector<1x128xf32>
    %289 = vector.broadcast %286 : vector<1x128xf32> to vector<8x128xf32>
    %290 = arith.mulf %266, %289 : vector<8x128xf32>
    %291 = vector.broadcast %288 : vector<1x128xf32> to vector<8x128xf32>
    %292 = arith.addf %290, %291 : vector<8x128xf32>
    %cst_88 = arith.constant 0.000000e+00 : f32
    %293 = vector.broadcast %cst_88 : f32 to vector<8x128xf32>
    %294 = arith.cmpf ogt, %292, %293 : vector<8x128xf32>
    %cst_89 = arith.constant 2.000000e-01 : f32
    %295 = vector.broadcast %cst_89 : f32 to vector<8x128xf32>
    %296 = arith.mulf %295, %292 : vector<8x128xf32>
    %297 = arith.select %294, %292, %296 : vector<8x128xi1>, vector<8x128xf32>
    %298 = arith.truncf %297 : vector<8x128xf32> to vector<8x128xbf16>
    %c0_90 = arith.constant 0 : index
    %c0_91 = arith.constant 0 : index
    %299 = vector.load %arg9[%c0_90, %c0_91] : memref<16x4xbf16, #tpu.memory_space<vmem>>, vector<16x4xbf16>
    %300 = vector.extract_strided_slice %298 {offsets = [0, 0], sizes = [4, 128], strides = [1, 1]} : vector<8x128xbf16> to vector<4x128xbf16>
    %cst_92 = arith.constant dense<0.000000e+00> : vector<16x128xf32>
    %301 = tpu.matmul %299, %300, %cst_92 {dimension_numbers = #tpu.dot_dimension_numbers<[1], [0], [0], [1], [0, 0, 1, 1], [], []>} : vector<16x4xbf16>, vector<4x128xbf16>, vector<16x128xf32> -> vector<16x128xf32>
    %302 = vector.extract_strided_slice %301 {offsets = [0, 0], sizes = [1, 128], strides = [1, 1]} : vector<16x128xf32> to vector<1x128xf32>
    %303 = vector.extract_strided_slice %301 {offsets = [1, 0], sizes = [1, 128], strides = [1, 1]} : vector<16x128xf32> to vector<1x128xf32>
    %c32_i32_93 = arith.constant 32 : i32
    %304 = tpu.dynamic_rotate %303 by %c32_i32_93 dim 1 : vector<1x128xf32>, i32 -> vector<1x128xf32>
    %305 = arith.addf %302, %304 : vector<1x128xf32>
    %306 = vector.extract_strided_slice %301 {offsets = [2, 0], sizes = [1, 128], strides = [1, 1]} : vector<16x128xf32> to vector<1x128xf32>
    %c64_i32_94 = arith.constant 64 : i32
    %307 = tpu.dynamic_rotate %306 by %c64_i32_94 dim 1 : vector<1x128xf32>, i32 -> vector<1x128xf32>
    %308 = arith.addf %305, %307 : vector<1x128xf32>
    %309 = vector.extract_strided_slice %301 {offsets = [3, 0], sizes = [1, 128], strides = [1, 1]} : vector<16x128xf32> to vector<1x128xf32>
    %c96_i32_95 = arith.constant 96 : i32
    %310 = tpu.dynamic_rotate %309 by %c96_i32_95 dim 1 : vector<1x128xf32>, i32 -> vector<1x128xf32>
    %311 = arith.addf %308, %310 : vector<1x128xf32>
    %312 = vector.extract_strided_slice %301 {offsets = [4, 0], sizes = [1, 128], strides = [1, 1]} : vector<16x128xf32> to vector<1x128xf32>
    %313 = vector.extract_strided_slice %301 {offsets = [5, 0], sizes = [1, 128], strides = [1, 1]} : vector<16x128xf32> to vector<1x128xf32>
    %c32_i32_96 = arith.constant 32 : i32
    %314 = tpu.dynamic_rotate %313 by %c32_i32_96 dim 1 : vector<1x128xf32>, i32 -> vector<1x128xf32>
    %315 = arith.addf %312, %314 : vector<1x128xf32>
    %316 = vector.extract_strided_slice %301 {offsets = [6, 0], sizes = [1, 128], strides = [1, 1]} : vector<16x128xf32> to vector<1x128xf32>
    %c64_i32_97 = arith.constant 64 : i32
    %317 = tpu.dynamic_rotate %316 by %c64_i32_97 dim 1 : vector<1x128xf32>, i32 -> vector<1x128xf32>
    %318 = arith.addf %315, %317 : vector<1x128xf32>
    %319 = vector.extract_strided_slice %301 {offsets = [7, 0], sizes = [1, 128], strides = [1, 1]} : vector<16x128xf32> to vector<1x128xf32>
    %c96_i32_98 = arith.constant 96 : i32
    %320 = tpu.dynamic_rotate %319 by %c96_i32_98 dim 1 : vector<1x128xf32>, i32 -> vector<1x128xf32>
    %321 = arith.addf %318, %320 : vector<1x128xf32>
    %322 = vector.extract_strided_slice %301 {offsets = [8, 0], sizes = [1, 128], strides = [1, 1]} : vector<16x128xf32> to vector<1x128xf32>
    %323 = vector.extract_strided_slice %301 {offsets = [9, 0], sizes = [1, 128], strides = [1, 1]} : vector<16x128xf32> to vector<1x128xf32>
    %c32_i32_99 = arith.constant 32 : i32
    %324 = tpu.dynamic_rotate %323 by %c32_i32_99 dim 1 : vector<1x128xf32>, i32 -> vector<1x128xf32>
    %325 = arith.addf %322, %324 : vector<1x128xf32>
    %326 = vector.extract_strided_slice %301 {offsets = [10, 0], sizes = [1, 128], strides = [1, 1]} : vector<16x128xf32> to vector<1x128xf32>
    %c64_i32_100 = arith.constant 64 : i32
    %327 = tpu.dynamic_rotate %326 by %c64_i32_100 dim 1 : vector<1x128xf32>, i32 -> vector<1x128xf32>
    %328 = arith.addf %325, %327 : vector<1x128xf32>
    %329 = vector.extract_strided_slice %301 {offsets = [11, 0], sizes = [1, 128], strides = [1, 1]} : vector<16x128xf32> to vector<1x128xf32>
    %c96_i32_101 = arith.constant 96 : i32
    %330 = tpu.dynamic_rotate %329 by %c96_i32_101 dim 1 : vector<1x128xf32>, i32 -> vector<1x128xf32>
    %331 = arith.addf %328, %330 : vector<1x128xf32>
    %332 = vector.extract_strided_slice %301 {offsets = [12, 0], sizes = [1, 128], strides = [1, 1]} : vector<16x128xf32> to vector<1x128xf32>
    %333 = vector.extract_strided_slice %301 {offsets = [13, 0], sizes = [1, 128], strides = [1, 1]} : vector<16x128xf32> to vector<1x128xf32>
    %c32_i32_102 = arith.constant 32 : i32
    %334 = tpu.dynamic_rotate %333 by %c32_i32_102 dim 1 : vector<1x128xf32>, i32 -> vector<1x128xf32>
    %335 = arith.addf %332, %334 : vector<1x128xf32>
    %336 = vector.extract_strided_slice %301 {offsets = [14, 0], sizes = [1, 128], strides = [1, 1]} : vector<16x128xf32> to vector<1x128xf32>
    %c64_i32_103 = arith.constant 64 : i32
    %337 = tpu.dynamic_rotate %336 by %c64_i32_103 dim 1 : vector<1x128xf32>, i32 -> vector<1x128xf32>
    %338 = arith.addf %335, %337 : vector<1x128xf32>
    %339 = vector.extract_strided_slice %301 {offsets = [15, 0], sizes = [1, 128], strides = [1, 1]} : vector<16x128xf32> to vector<1x128xf32>
    %c96_i32_104 = arith.constant 96 : i32
    %340 = tpu.dynamic_rotate %339 by %c96_i32_104 dim 1 : vector<1x128xf32>, i32 -> vector<1x128xf32>
    %341 = arith.addf %338, %340 : vector<1x128xf32>
    %342 = tpu.concatenate %311, %321, %331, %341 in 1 : vector<1x128xf32>, vector<1x128xf32>, vector<1x128xf32>, vector<1x128xf32> -> vector<1x512xf32>
    %343 = vector.extract_strided_slice %298 {offsets = [4, 0], sizes = [4, 128], strides = [1, 1]} : vector<8x128xbf16> to vector<4x128xbf16>
    %cst_105 = arith.constant dense<0.000000e+00> : vector<16x128xf32>
    %344 = tpu.matmul %299, %343, %cst_105 {dimension_numbers = #tpu.dot_dimension_numbers<[1], [0], [0], [1], [0, 0, 1, 1], [], []>} : vector<16x4xbf16>, vector<4x128xbf16>, vector<16x128xf32> -> vector<16x128xf32>
    %345 = vector.extract_strided_slice %344 {offsets = [0, 0], sizes = [1, 128], strides = [1, 1]} : vector<16x128xf32> to vector<1x128xf32>
    %346 = vector.extract_strided_slice %344 {offsets = [1, 0], sizes = [1, 128], strides = [1, 1]} : vector<16x128xf32> to vector<1x128xf32>
    %c32_i32_106 = arith.constant 32 : i32
    %347 = tpu.dynamic_rotate %346 by %c32_i32_106 dim 1 : vector<1x128xf32>, i32 -> vector<1x128xf32>
    %348 = arith.addf %345, %347 : vector<1x128xf32>
    %349 = vector.extract_strided_slice %344 {offsets = [2, 0], sizes = [1, 128], strides = [1, 1]} : vector<16x128xf32> to vector<1x128xf32>
    %c64_i32_107 = arith.constant 64 : i32
    %350 = tpu.dynamic_rotate %349 by %c64_i32_107 dim 1 : vector<1x128xf32>, i32 -> vector<1x128xf32>
    %351 = arith.addf %348, %350 : vector<1x128xf32>
    %352 = vector.extract_strided_slice %344 {offsets = [3, 0], sizes = [1, 128], strides = [1, 1]} : vector<16x128xf32> to vector<1x128xf32>
    %c96_i32_108 = arith.constant 96 : i32
    %353 = tpu.dynamic_rotate %352 by %c96_i32_108 dim 1 : vector<1x128xf32>, i32 -> vector<1x128xf32>
    %354 = arith.addf %351, %353 : vector<1x128xf32>
    %355 = vector.extract_strided_slice %344 {offsets = [4, 0], sizes = [1, 128], strides = [1, 1]} : vector<16x128xf32> to vector<1x128xf32>
    %356 = vector.extract_strided_slice %344 {offsets = [5, 0], sizes = [1, 128], strides = [1, 1]} : vector<16x128xf32> to vector<1x128xf32>
    %c32_i32_109 = arith.constant 32 : i32
    %357 = tpu.dynamic_rotate %356 by %c32_i32_109 dim 1 : vector<1x128xf32>, i32 -> vector<1x128xf32>
    %358 = arith.addf %355, %357 : vector<1x128xf32>
    %359 = vector.extract_strided_slice %344 {offsets = [6, 0], sizes = [1, 128], strides = [1, 1]} : vector<16x128xf32> to vector<1x128xf32>
    %c64_i32_110 = arith.constant 64 : i32
    %360 = tpu.dynamic_rotate %359 by %c64_i32_110 dim 1 : vector<1x128xf32>, i32 -> vector<1x128xf32>
    %361 = arith.addf %358, %360 : vector<1x128xf32>
    %362 = vector.extract_strided_slice %344 {offsets = [7, 0], sizes = [1, 128], strides = [1, 1]} : vector<16x128xf32> to vector<1x128xf32>
    %c96_i32_111 = arith.constant 96 : i32
    %363 = tpu.dynamic_rotate %362 by %c96_i32_111 dim 1 : vector<1x128xf32>, i32 -> vector<1x128xf32>
    %364 = arith.addf %361, %363 : vector<1x128xf32>
    %365 = vector.extract_strided_slice %344 {offsets = [8, 0], sizes = [1, 128], strides = [1, 1]} : vector<16x128xf32> to vector<1x128xf32>
    %366 = vector.extract_strided_slice %344 {offsets = [9, 0], sizes = [1, 128], strides = [1, 1]} : vector<16x128xf32> to vector<1x128xf32>
    %c32_i32_112 = arith.constant 32 : i32
    %367 = tpu.dynamic_rotate %366 by %c32_i32_112 dim 1 : vector<1x128xf32>, i32 -> vector<1x128xf32>
    %368 = arith.addf %365, %367 : vector<1x128xf32>
    %369 = vector.extract_strided_slice %344 {offsets = [10, 0], sizes = [1, 128], strides = [1, 1]} : vector<16x128xf32> to vector<1x128xf32>
    %c64_i32_113 = arith.constant 64 : i32
    %370 = tpu.dynamic_rotate %369 by %c64_i32_113 dim 1 : vector<1x128xf32>, i32 -> vector<1x128xf32>
    %371 = arith.addf %368, %370 : vector<1x128xf32>
    %372 = vector.extract_strided_slice %344 {offsets = [11, 0], sizes = [1, 128], strides = [1, 1]} : vector<16x128xf32> to vector<1x128xf32>
    %c96_i32_114 = arith.constant 96 : i32
    %373 = tpu.dynamic_rotate %372 by %c96_i32_114 dim 1 : vector<1x128xf32>, i32 -> vector<1x128xf32>
    %374 = arith.addf %371, %373 : vector<1x128xf32>
    %375 = vector.extract_strided_slice %344 {offsets = [12, 0], sizes = [1, 128], strides = [1, 1]} : vector<16x128xf32> to vector<1x128xf32>
    %376 = vector.extract_strided_slice %344 {offsets = [13, 0], sizes = [1, 128], strides = [1, 1]} : vector<16x128xf32> to vector<1x128xf32>
    %c32_i32_115 = arith.constant 32 : i32
    %377 = tpu.dynamic_rotate %376 by %c32_i32_115 dim 1 : vector<1x128xf32>, i32 -> vector<1x128xf32>
    %378 = arith.addf %375, %377 : vector<1x128xf32>
    %379 = vector.extract_strided_slice %344 {offsets = [14, 0], sizes = [1, 128], strides = [1, 1]} : vector<16x128xf32> to vector<1x128xf32>
    %c64_i32_116 = arith.constant 64 : i32
    %380 = tpu.dynamic_rotate %379 by %c64_i32_116 dim 1 : vector<1x128xf32>, i32 -> vector<1x128xf32>
    %381 = arith.addf %378, %380 : vector<1x128xf32>
    %382 = vector.extract_strided_slice %344 {offsets = [15, 0], sizes = [1, 128], strides = [1, 1]} : vector<16x128xf32> to vector<1x128xf32>
    %c96_i32_117 = arith.constant 96 : i32
    %383 = tpu.dynamic_rotate %382 by %c96_i32_117 dim 1 : vector<1x128xf32>, i32 -> vector<1x128xf32>
    %384 = arith.addf %381, %383 : vector<1x128xf32>
    %385 = tpu.concatenate %354, %364, %374, %384 in 1 : vector<1x128xf32>, vector<1x128xf32>, vector<1x128xf32>, vector<1x128xf32> -> vector<1x512xf32>
    %386 = tpu.concatenate %342, %385 in 0 : vector<1x512xf32>, vector<1x512xf32> -> vector<2x512xf32>
    %387 = arith.truncf %386 : vector<2x512xf32> to vector<2x512xbf16>
    %c0_118 = arith.constant 0 : index
    %c0_119 = arith.constant 0 : index
    %388 = vector.load %arg10[%c0_118, %c0_119] : memref<512x128xbf16, #tpu.memory_space<vmem>>, vector<512x128xbf16>
    %cst_120 = arith.constant dense<0.000000e+00> : vector<2x128xf32>
    %389 = tpu.matmul %387, %388, %cst_120 {dimension_numbers = #tpu.dot_dimension_numbers<[1], [0], [0], [1], [0, 0, 1, 1], [], []>} : vector<2x512xbf16>, vector<512x128xbf16>, vector<2x128xf32> -> vector<2x128xf32>
    %c0_121 = arith.constant 0 : index
    %c0_122 = arith.constant 0 : index
    %390 = vector.load %arg11[%c0_121, %c0_122] : memref<1x128xf32, #tpu.memory_space<vmem>>, vector<1x128xf32>
    %391 = vector.broadcast %390 : vector<1x128xf32> to vector<2x128xf32>
    %392 = arith.addf %389, %391 : vector<2x128xf32>
    %393 = vector.extract_strided_slice %392 {offsets = [0, 0], sizes = [1, 128], strides = [1, 1]} : vector<2x128xf32> to vector<1x128xf32>
    %394 = vector.extract_strided_slice %392 {offsets = [1, 0], sizes = [1, 128], strides = [1, 1]} : vector<2x128xf32> to vector<1x128xf32>
    %c64_i32_123 = arith.constant 64 : i32
    %395 = tpu.dynamic_rotate %394 by %c64_i32_123 dim 1 : vector<1x128xf32>, i32 -> vector<1x128xf32>
    %396 = arith.addf %393, %395 : vector<1x128xf32>
    %397 = arith.negf %396 : vector<1x128xf32>
    %398 = math.exp %397 : vector<1x128xf32>
    %cst_124 = arith.constant 1.000000e+00 : f32
    %399 = vector.broadcast %cst_124 : f32 to vector<1x128xf32>
    %400 = arith.addf %399, %398 : vector<1x128xf32>
    %401 = arith.divf %399, %400 : vector<1x128xf32>
    %c0_125 = arith.constant 0 : index
    %c0_126 = arith.constant 0 : index
    %402 = vector.load %arg12[%c0_125, %c0_126] : memref<1x128xf32, #tpu.memory_space<vmem>>, vector<1x128xf32>
    tpu.vector_store %arg12[%c0_125, %c0_126], %401 {strides = array<i32>} : memref<1x128xf32, #tpu.memory_space<vmem>>, vector<1x128xf32>,
    return
  }
}

</mosaic_0001>

<bundles_post_ra>
// kernel: discriminator_forward.1
= control target key start
LH: loop header
LB: loop body
LE: loop exit
PB: predicated region body
PF: predicated region fallthrough
CT: control target
= control target key end

     0   :  { %vm107_vm0 = vcmask 130048   ;;  %s3684_s0 = inlined_call_operand.vmem [shape: bf16[128,16], index: 0, kind: input, shape index: {}]   ;;  %s3685_s1 = inlined_call_operand.vmem [shape: bf16[16,128], index: 1, kind: input, shape index: {}]   ;;  %s3686_s2 = inlined_call_operand.vmem [shape: f32[2,128], index: 2, kind: input, shape index: {}]   ;;  %s3687_s3 = inlined_call_operand.vmem [shape: bf16[256,64], index: 3, kind: input, shape index: {}]   ;;  %s3688_s4 = inlined_call_operand.vmem [shape: bf16[128,128], index: 4, kind: input, shape index: {}]   ;;  %s3689_s5 = inlined_call_operand.vmem [shape: f32[2,128], index: 5, kind: input, shape index: {}]   ;;  %s3690_s6 = inlined_call_operand.vmem [shape: bf16[64,16], index: 6, kind: input, shape index: {}]   ;;  %s3691_s7 = inlined_call_operand.vmem [shape: bf16[256,128], index: 7, kind: input, shape index: {}]   ;;  %s3692_s8 = inlined_call_operand.vmem [shape: f32[2,128], index: 8, kind: input, shape index: {}]   ;;  %s3693_s9 = inlined_call_operand.vmem [shape: bf16[16,4], index: 9, kind: input, shape index: {}]   ;;  %s3694_s10 = inlined_call_operand.vmem [shape: bf16[512,128], index: 10, kind: input, shape index: {}]   ;;  %s3695_s11 = inlined_call_operand.vmem [shape: f32[1,128], index: 11, kind: input, shape index: {}]   ;;  %s3696_s12 = inlined_call_operand.hbm [shape: f32[1,128], index: 12, kind: output, shape index: {}]  }
   0x1   :  { %v2871_v0 = vld [vmem:[%s3685_s1] sm:$0xff]   ;;  %v2873_v2 = vld [vmem:[%s3684_s0 + $0x8] sm:$0xff]   ;;  %v2874_v3 = vld [vmem:[%s3684_s0 + $0x10] sm:$0xff]  }
   0x2   :  { %v2872_v1 = vld [vmem:[%s3684_s0] sm:$0xff]   ;;  %2703 = vmatprep.subr.bf16.mxu0 %v2871_v0  ;;  %v2875_v4 = vld [vmem:[%s3684_s0 + $0x18] sm:$0xff]   ;;  %v2877_v6 = vld [vmem:[%s3684_s0 + $0x28] sm:$0xff]  }
   0x3   :  { %2704 = vmatpush3.bf16.msra.mxu0 %v2871_v0  ;;  %2705 = vmatprep.mubr.msk.bf16.mxu0 %vm107_vm0, %v2872_v1  ;;  %v2876_v5 = vld [vmem:[%s3684_s0 + $0x20] sm:$0xff]   ;;  %v2878_v7 = vld [vmem:[%s3684_s0 + $0x30] sm:$0xff]   ;;  %v2879_v8 = vld [vmem:[%s3684_s0 + $0x38] sm:$0xff]  }
   0x6   :  { %2706 = vmatmul.mubr.msk.bf16.vlgmr.msra.gmra.mrb[0].mxu0 %vm107_vm0, %v2873_v2 }
   0x7   :  { %2709 = vmatprep.mubr.msk.bf16.mxu0 %vm107_vm0, %v2874_v3 }
   0xe   :  { %2710 = vmatmul.mubr.msk.bf16.gmra.mrb[4].mxu0 %vm107_vm0, %v2875_v4 }
   0xf   :  { %2713 = vmatprep.mubr.msk.bf16.mxu0 %vm107_vm0, %v2876_v5 }
  0x16   :  { %2714 = vmatmul.mubr.msk.bf16.gmra.mrb[8].mxu0 %vm107_vm0, %v2877_v6 }
  0x17   :  { %2717 = vmatprep.mubr.msk.bf16.mxu0 %vm107_vm0, %v2878_v7 }
  0x1e   :  { %2718 = vmatmul.mubr.msk.bf16.gmra.mrb[12].mxu0 %vm107_vm0, %v2879_v8 }
  0x1f   :  { %17 = vsyncpa [#allocation3], 0  ;;  %v2880_v9 = vld [vmem:[%s3687_s3] sm:$0xff]   ;;  %vm509_vm1 = vcmask 523264   ;;  %s2991_s30 = smov 8   ;;  %s2993_s13 = smov 16  }
  0x20   :  { %2729 = vmatprep.mubr.msk.bf16.mxu1 %vm509_vm1, %v2880_v9  ;;  %2769 = vmatprep.mubr.msk.bf16.mxu0 %vm509_vm1, %v2880_v9  ;;  %s2994_s14 = smov 40   ;;  %s2995_s15 = smov 32  }
  0x21   :  { %s2996_s16 = smov 56   ;;  %s2997_s17 = smov 48  }
  0x22   :  { %s2998_s18 = smov 72   ;;  %s2999_s19 = smov 64  }
  0x23   :  { %s3000_s20 = smov 88   ;;  %s3001_s22 = smov 80  }
  0x24   :  { %s3002_s26 = smov 104  }
  0xd9   :  { %v3114_v10 = vpop.f32.mrb[0].mxu0 }
  0xda   :  { %v3116_v11 = vpop.f32.mrb[1].mxu0  ;;  %v253_v17 = vmul.f32 %v3114_v10, %v3114_v10 }
  0xdb   :  { %v3118_v12 = vpop.f32.mrb[2].mxu0  ;;  %v251_v14 = vmul.f32 %v3116_v11, %v3116_v11 }
  0xdc   :  { %v3120_v13 = vpop.f32.mrb[3].mxu0  ;;  %v254_v20 = vmul.f32 %v3118_v12, %v3118_v12 }
  0xdd   :  { %v230_v15 = vadd.f32 %v3120_v13, %v3116_v11  ;;  %v252_v16 = vmul.f32 %v3120_v13, %v3120_v13 }
  0xdf   :  { %v231_v18 = vadd.f32 %v3114_v10, %v230_v15  ;;  %v267_v19 = vadd.f32 %v252_v16, %v251_v14 }
  0xe1   :  { %v268_v21 = vadd.f32 %v267_v19, %v253_v17  ;;  %v3133_v22 = vpop.f32.mrb[4].mxu0  ;;  %v232_v23 = vadd.f32 %v3118_v12, %v231_v18 }
  0xe2   :  { %v3136_v24 = vpop.f32.mrb[5].mxu0  ;;  %v257_v33 = vmul.f32 %v3133_v22, %v3133_v22 }
  0xe3   :  { %v233_v25 = vadd.f32 %v232_v23, %v3136_v24  ;;  %v255_v26 = vmul.f32 %v3136_v24, %v3136_v24  ;;  %v269_v27 = vadd.f32 %v268_v21, %v254_v20  ;;  %v3141_v28 = vpop.f32.mrb[6].mxu0 }
  0xe4   :  { %v3143_v29 = vpop.f32.mrb[7].mxu0  ;;  %v258_v36 = vmul.f32 %v3141_v28, %v3141_v28 }
  0xe5   :  { %v270_v30 = vadd.f32 %v269_v27, %v255_v26  ;;  %v234_v31 = vadd.f32 %v233_v25, %v3143_v29  ;;  %v256_v32 = vmul.f32 %v3143_v29, %v3143_v29 }
  0xe7   :  { %v235_v34 = vadd.f32 %v3133_v22, %v234_v31  ;;  %v271_v35 = vadd.f32 %v270_v30, %v256_v32 }
  0xe9   :  { %v272_v37 = vadd.f32 %v271_v35, %v257_v33  ;;  %v3153_v38 = vpop.f32.mrb[8].mxu0  ;;  %v236_v39 = vadd.f32 %v3141_v28, %v235_v34  ;;  %v301_v34 = vlaneseq }
  0xea   :  { %v3156_v40 = vpop.f32.mrb[9].mxu0  ;;  %v261_v49 = vmul.f32 %v3153_v38, %v3153_v38 }
  0xeb   :  { %v237_v41 = vadd.f32 %v236_v39, %v3156_v40  ;;  %v259_v42 = vmul.f32 %v3156_v40, %v3156_v40  ;;  %v273_v43 = vadd.f32 %v272_v37, %v258_v36  ;;  %v3161_v44 = vpop.f32.mrb[10].mxu0  ;;  %v302_v35 = vshrl.u32 %v301_v34, 7  ;;  %v229_v36 = vld [vmem:[%s3686_s2] sm:$0x3]  ;;  %s3005_s2 = smov 112  }
  0xec   :  { %v201_v45 = vpop.f32.mrb[11].mxu0  ;;  %v262_v52 = vmul.f32 %v3161_v44, %v3161_v44 }
  0xed   :  { %v274_v46 = vadd.f32 %v273_v43, %v259_v42  ;;  %v238_v47 = vadd.f32 %v237_v41, %v201_v45  ;;  %v260_v48 = vmul.f32 %v201_v45, %v201_v45  ;;  %v3177_v37 = vsub.s32 0, %v302_v35 }
  0xef   :  { %v239_v50 = vadd.f32 %v3153_v38, %v238_v47  ;;  %v275_v51 = vadd.f32 %v274_v46, %v260_v48  ;;  %v3180_v46 = vsub.s32 1, %v302_v35 }
  0xf1   :  { %v276_v53 = vadd.f32 %v275_v51, %v261_v49  ;;  %v3168_v54 = vpop.f32.mrb[12].mxu0  ;;  %v240_v55 = vadd.f32 %v3161_v44, %v239_v50 }
  0xf2   :  { %v214_v56 = vpop.f32.mrb[13].mxu0  ;;  %v265_v1 = vmul.f32 %v3168_v54, %v3168_v54 }
  0xf3   :  { %v241_v57 = vadd.f32 %v240_v55, %v214_v56  ;;  %v263_v58 = vmul.f32 %v214_v56, %v214_v56  ;;  %v277_v59 = vadd.f32 %v276_v53, %v262_v52  ;;  %v2720_v60 = vpop.f32.mrb[14].mxu0 }
  0xf4   :  { %v217_v61 = vpop.f32.mrb[15].mxu0  ;;  %v266_v4 = vmul.f32 %v2720_v60, %v2720_v60 }
  0xf5   :  { %v278_v62 = vadd.f32 %v277_v59, %v263_v58  ;;  %v242_v63 = vadd.f32 %v241_v57, %v217_v61  ;;  %v264_v0 = vmul.f32 %v217_v61, %v217_v61 }
  0xf7   :  { %v243_v2 = vadd.f32 %v3168_v54, %v242_v63  ;;  %v279_v3 = vadd.f32 %v278_v62, %v264_v0 }
  0xf9   :  { %v244_v5 = vadd.f32 %v2720_v60, %v243_v2  ;;  %v280_v6 = vadd.f32 %v279_v3, %v265_v1 }
  0xfb   :  { %v245_v7 = vrot.slane %v244_v5, 4  ;;  %v281_v8 = vadd.f32 %v280_v6, %v266_v4 }
  0xfd   :  { %v246_v9 = vadd.f32 %v245_v7, %v244_v5  ;;  %v282_v14 = vrot.slane %v281_v8, 4 }
  0xff   :  { %v247_v15 = vrot.slane %v246_v9, 2  ;;  %v283_v16 = vadd.f32 %v282_v14, %v281_v8 }
 0x101   :  { %v248_v17 = vadd.f32 %v247_v15, %v246_v9  ;;  %v284_v18 = vrot.slane %v283_v16, 2 }
 0x103   :  { %v249_v19 = vrot.slane %v248_v17, 1  ;;  %v285_v20 = vadd.f32 %v284_v18, %v283_v16 }
 0x105   :  { %v250_v21 = vadd.f32 %v249_v19, %v248_v17  ;;  %v286_v23 = vrot.slane %v285_v20, 1 }
 0x107   :  { %v287_v25 = vadd.f32 %v286_v23, %v285_v20  ;;  %v288_v26 = vmul.f32 0.0078125, %v250_v21 }
 0x109   :  { %v289_v27 = vmul.f32 0.0078125, %v287_v25  ;;  %v290_v30 = vmul.f32 %v288_v26, %v288_v26 }
 0x10b   :  { %v291_v31 = vsub.f32 %v289_v27, %v290_v30 }
 0x10d   :  { %v292_v32 = vmax.f32 %v291_v31, 0.0 }
 0x10f   :  { %v293_v33 = vadd.f32 1e-05, %v292_v32 }
 0x111   :  { %2957 = vrsqrt.f32 %v293_v33 }
 0x11b   :  { %v2958_v39 = vpop.eup %2957 }
 0x11c   :  { %v295_v41 = vmul.f32 %v2958_v39, %v229_v36 }
 0x11e   :  { %v296_v42 = vmul.f32 %v295_v41, %v288_v26  ;;  %v304_v43 = vrot.slane %v295_v41, %v3177_v37 }
 0x120   :  { %v298_v47 = vrot.slane %v296_v42, 7  ;;  %v318_v48 = vmul.f32 %v304_v43, %v217_v61  ;;  %v305_v49 = vmul.f32 %v304_v43, %v3116_v11  ;;  %v306_v50 = vmul.f32 %v304_v43, %v3120_v13 }
 0x121   :  { %v313_v51 = vmul.f32 %v304_v43, %v3156_v40  ;;  %v314_v52 = vmul.f32 %v304_v43, %v201_v45  ;;  %v307_v53 = vmul.f32 %v3114_v10, %v304_v43  ;;  %v308_v55 = vmul.f32 %v3118_v12, %v304_v43 }
 0x122   :  { %v300_v57 = vsub.f32 %v229_v36, %v298_v47  ;;  %v315_v58 = vmul.f32 %v3153_v38, %v304_v43  ;;  %v316_v59 = vmul.f32 %v3161_v44, %v304_v43  ;;  %v309_v62 = vmul.f32 %v304_v43, %v3136_v24 }
 0x123   :  { %v310_v61 = vmul.f32 %v304_v43, %v3143_v29  ;;  %v317_v63 = vmul.f32 %v304_v43, %v214_v56  ;;  %v311_v11 = vmul.f32 %v3133_v22, %v304_v43  ;;  %v312_v13 = vmul.f32 %v3141_v28, %v304_v43 }
 0x124   :  { %v3194_v40 = vrot.slane %v300_v57, %v3180_v46  ;;  %v3197_v10 = vmul.f32 %v3168_v54, %v304_v43  ;;  %v3199_v12 = vmul.f32 %v2720_v60, %v304_v43 }
 0x126   :  { %v338_v38 = vadd.f32 %v3194_v40, %v318_v48  ;;  %v325_v44 = vadd.f32 %v3194_v40, %v305_v49  ;;  %v326_v24 = vadd.f32 %v3194_v40, %v306_v50  ;;  %v333_v29 = vadd.f32 %v3194_v40, %v313_v51 }
 0x127   :  { %v334_v22 = vadd.f32 %v3194_v40, %v314_v52  ;;  %v327_v28 = vadd.f32 %v3194_v40, %v307_v53  ;;  %v328_v45 = vadd.f32 %v3194_v40, %v308_v55  ;;  %v335_v56 = vadd.f32 %v3194_v40, %v315_v58 }
 0x128   :  { %vm341_vm2 = vcmp.gt.f32.partialorder %v325_v44, 0.0  ;;  %vm342_vm3 = vcmp.gt.f32.partialorder %v326_v24, 0.0  ;;  %v357_v54 = vmul.f32 0.2, %v325_v44  ;;  %v358_v60 = vmul.f32 0.2, %v326_v24 }
 0x129   :  { %vm349_vm4 = vcmp.gt.f32.partialorder %v333_v29, 0.0  ;;  %vm350_vm5 = vcmp.gt.f32.partialorder %v334_v22, 0.0  ;;  %v365_v0 = vmul.f32 0.2, %v333_v29  ;;  %v366_v1 = vmul.f32 0.2, %v334_v22 }
 0x12a   :  { %v373_v2 = vsel %vm341_vm2, %v325_v44, %v357_v54  ;;  %v374_v3 = vsel %vm342_vm3, %v326_v24, %v358_v60  ;;  %vm343_vm6 = vcmp.gt.f32.partialorder %v327_v28, 0.0  ;;  %vm344_vm7 = vcmp.gt.f32.partialorder %v328_v45, 0.0  ;;  %v2888_v44 = vld [vmem:[%s3687_s3 + $0x40] sm:$0xff]   ;;  %v2889_v24 = vld [vmem:[%s3687_s3 + $0x48] sm:$0xff]   ;;  %v2895_v54 = vld [vmem:[%s3687_s3 + $0x78] sm:$0xff]  }
 0x12b   :  { %v389_v4 = vpack.c.bf16 %v374_v3, %v373_v2  ;;  %v381_v5 = vsel %vm349_vm4, %v333_v29, %v365_v0  ;;  %v382_v6 = vsel %vm350_vm5, %v334_v22, %v366_v1  ;;  %v359_v7 = vmul.f32 0.2, %v327_v28  ;;  %v2890_v29 = vld [vmem:[%s3687_s3 + $0x50] sm:$0xff]   ;;  %v2891_v22 = vld [vmem:[%s3687_s3 + $0x58] sm:$0xff]  }
 0x12c   :  { %v393_v8 = vpack.c.bf16 %v382_v6, %v381_v5  ;;  %v360_v9 = vmul.f32 0.2, %v328_v45  ;;  %v336_v14 = vadd.f32 %v3194_v40, %v316_v59  ;;  %vm351_vm8 = vcmp.gt.f32.partialorder %v335_v56, 0.0 }
 0x12d   :  { %2721 = vmatprep.subr.bf16.mxu1 %v389_v4  ;;  %v375_v15 = vsel %vm343_vm6, %v327_v28, %v359_v7  ;;  %v367_v16 = vmul.f32 0.2, %v335_v56  ;;  %v329_v17 = vadd.f32 %v3194_v40, %v309_v62  ;;  %v330_v18 = vadd.f32 %v3194_v40, %v310_v61  ;;  %v2892_v28 = vld [vmem:[%s3687_s3 + $0x60] sm:$0xff]  }
 0x12e   :  { %2761 = vmatprep.subr.bf16.mxu0 %v393_v8  ;;  %2722 = vmatpush3.bf16.msra.mxu1 %v389_v4  ;;  %v376_v19 = vsel %vm344_vm7, %v328_v45, %v360_v9  ;;  %vm352_vm9 = vcmp.gt.f32.partialorder %v336_v14, 0.0  ;;  %v368_v20 = vmul.f32 0.2, %v336_v14  ;;  %v337_v21 = vadd.f32 %v3194_v40, %v317_v63  ;;  %v2881_v63 = vld [vmem:[%s3687_s3 + $0x8] sm:$0xff]  }
 0x12f   :  { %2762 = vmatpush3.bf16.msra.mxu0 %v393_v8  ;;  %v390_v23 = vpack.c.bf16 %v376_v19, %v375_v15  ;;  %v383_v25 = vsel %vm351_vm8, %v335_v56, %v367_v16  ;;  %vm345_vm10 = vcmp.gt.f32.partialorder %v329_v17, 0.0  ;;  %vm346_vm11 = vcmp.gt.f32.partialorder %v330_v18, 0.0  ;;  %v2893_v45 = vld [vmem:[%s3687_s3 + $0x68] sm:$0xff]   ;;  %v2894_v56 = vld [vmem:[%s3687_s3 + $0x70] sm:$0xff]  }
 0x130   :  { %v384_v26 = vsel %vm352_vm9, %v336_v14, %v368_v20  ;;  %v361_v27 = vmul.f32 0.2, %v329_v17  ;;  %v362_v30 = vmul.f32 0.2, %v330_v18  ;;  %vm353_vm12 = vcmp.gt.f32.partialorder %v337_v21, 0.0 }
 0x131   :  { %2723 = vmatprep.subr.bf16.mxu1 %v390_v23  ;;  %v394_v31 = vpack.c.bf16 %v384_v26, %v383_v25  ;;  %vm354_vm13 = vcmp.gt.f32.partialorder %v338_v38, 0.0  ;;  %v369_v32 = vmul.f32 0.2, %v337_v21  ;;  %v370_v33 = vmul.f32 0.2, %v338_v38 }
 0x132   :  { %2724 = vmatpush3.bf16.msra.mxu1 %v390_v23  ;;  %v377_v34 = vsel %vm345_vm10, %v329_v17, %v361_v27  ;;  %v378_v35 = vsel %vm346_vm11, %v330_v18, %v362_v30  ;;  %v331_v36 = vadd.f32 %v3194_v40, %v311_v11  ;;  %v332_v39 = vadd.f32 %v3194_v40, %v312_v13  ;;  %v2882_v11 = vld [vmem:[%s3687_s3 + $0x10] sm:$0xff]   ;;  %v2883_v13 = vld [vmem:[%s3687_s3 + $0x18] sm:$0xff]  }
 0x133   :  { %2763 = vmatprep.subr.bf16.mxu0 %v394_v31  ;;  %v391_v41 = vpack.c.bf16 %v378_v35, %v377_v34  ;;  %v385_v42 = vsel %vm353_vm12, %v337_v21, %v369_v32  ;;  %v386_v43 = vsel %vm354_vm13, %v338_v38, %v370_v33  ;;  %v339_v47 = vadd.f32 %v3194_v40, %v3197_v10  ;;  %v2885_v10 = vld [vmem:[%s3687_s3 + $0x28] sm:$0xff]   ;;  %v2887_v38 = vld [vmem:[%s3687_s3 + $0x38] sm:$0xff]  }
 0x134   :  { %2764 = vmatpush3.bf16.msra.mxu0 %v394_v31  ;;  %v395_v48 = vpack.c.bf16 %v386_v43, %v385_v42  ;;  %vm347_vm14 = vcmp.gt.f32.partialorder %v331_v36, 0.0  ;;  %vm348_vm15 = vcmp.gt.f32.partialorder %v332_v39, 0.0  ;;  %v363_v49 = vmul.f32 0.2, %v331_v36 }
 0x135   :  { %2725 = vmatprep.subr.bf16.mxu1 %v391_v41  ;;  %v364_v50 = vmul.f32 0.2, %v332_v39  ;;  %v340_v51 = vadd.f32 %v3194_v40, %v3199_v12  ;;  %vm355_vm2 = vcmp.gt.f32.partialorder %v339_v47, 0.0  ;;  %v371_v52 = vmul.f32 0.2, %v339_v47  ;;  %v2884_v40 = vld [vmem:[%s3687_s3 + $0x20] sm:$0xff]  }
 0x136   :  { %2765 = vmatprep.subr.bf16.mxu0 %v395_v48  ;;  %2726 = vmatpush3.bf16.msra.mxu1 %v391_v41  ;;  %v379_v53 = vsel %vm347_vm14, %v331_v36, %v363_v49  ;;  %v2886_v12 = vld [vmem:[%s3687_s3 + $0x30] sm:$0xff]   ;;  %s2992_s3 = smov 24   ;;  %vm3007_vm7 = vmmov 0   ;;  %vm1774_vm9 = vcmask 1041408   ;;  %vm1770_vm10 = vcmask 31744  }
 0x137   :  { %v380_v55 = vsel %vm348_vm15, %v332_v39, %v364_v50  ;;  %vm356_vm3 = vcmp.gt.f32.partialorder %v340_v51, 0.0  ;;  %v372_v57 = vmul.f32 0.2, %v340_v51  ;;  %v387_v58 = vsel %vm355_vm2, %v339_v47, %v371_v52 }
 0x138   :  { %2766 = vmatpush3.bf16.msra.mxu0 %v395_v48  ;;  %v392_v59 = vpack.c.bf16 %v380_v55, %v379_v53  ;;  %vm2045_vm11 = vcmask 1040384  }
 0x139   :  { %v388_v62 = vsel %vm356_vm3, %v340_v51, %v372_v57 }
 0x13a   :  { %2727 = vmatprep.subr.bf16.mxu1 %v392_v59  ;;  %v396_v61 = vpack.c.bf16 %v388_v62, %v387_v58 }
 0x13b   :  { %2728 = vmatpush3.bf16.msra.mxu1 %v392_v59 }
 0x13c   :  { %2767 = vmatprep.subr.bf16.mxu0 %v396_v61 }
 0x13d   :  { %2768 = vmatpush3.bf16.msra.mxu0 %v396_v61 }
 0x13e   :  { %2730 = vmatmul.mubr.msk.bf16.vlgmr.msra.gmra.mrb[0].mxu1 %vm509_vm1, %v2881_v63 }
 0x13f   :  { %2733 = vmatprep.mubr.msk.bf16.mxu1 %vm509_vm1, %v2882_v11 }
 0x140   :  { %2770 = vmatmul.mubr.msk.bf16.vlgmr.msra.gmra.mrb[16].mxu0 %vm509_vm1, %v2881_v63 }
 0x141   :  { %2773 = vmatprep.mubr.msk.bf16.mxu0 %vm509_vm1, %v2882_v11 }
 0x146   :  { %2734 = vmatmul.mubr.msk.bf16.gmra.mrb[4].mxu1 %vm509_vm1, %v2883_v13 }
 0x147   :  { %2737 = vmatprep.mubr.msk.bf16.mxu1 %vm509_vm1, %v2884_v40 }
 0x148   :  { %2774 = vmatmul.mubr.msk.bf16.gmra.mrb[20].mxu0 %vm509_vm1, %v2883_v13 }
 0x149   :  { %2777 = vmatprep.mubr.msk.bf16.mxu0 %vm509_vm1, %v2884_v40 }
 0x14e   :  { %2738 = vmatmul.mubr.msk.bf16.gmra.mrb[8].mxu1 %vm509_vm1, %v2885_v10 }
 0x14f   :  { %2741 = vmatprep.mubr.msk.bf16.mxu1 %vm509_vm1, %v2886_v12 }
 0x150   :  { %2778 = vmatmul.mubr.msk.bf16.gmra.mrb[24].mxu0 %vm509_vm1, %v2885_v10 }
 0x151   :  { %2781 = vmatprep.mubr.msk.bf16.mxu0 %vm509_vm1, %v2886_v12 }
 0x156   :  { %2742 = vmatmul.mubr.msk.bf16.gmra.mrb[12].mxu1 %vm509_vm1, %v2887_v38 }
 0x157   :  { %2745 = vmatprep.mubr.msk.bf16.mxu1 %vm509_vm1, %v2888_v44 }
 0x158   :  { %2782 = vmatmul.mubr.msk.bf16.gmra.mrb[28].mxu0 %vm509_vm1, %v2887_v38 }
 0x159   :  { %2785 = vmatprep.mubr.msk.bf16.mxu0 %vm509_vm1, %v2888_v44 }
 0x15e   :  { %2746 = vmatmul.mubr.msk.bf16.gmra.mrb[16].mxu1 %vm509_vm1, %v2889_v24 }
 0x15f   :  { %2749 = vmatprep.mubr.msk.bf16.mxu1 %vm509_vm1, %v2890_v29 }
 0x160   :  { %2786 = vmatmul.mubr.msk.bf16.gmra.mrb[32].mxu0 %vm509_vm1, %v2889_v24 }
 0x161   :  { %2789 = vmatprep.mubr.msk.bf16.mxu0 %vm509_vm1, %v2890_v29 }
 0x166   :  { %2750 = vmatmul.mubr.msk.bf16.gmra.mrb[20].mxu1 %vm509_vm1, %v2891_v22 }
 0x167   :  { %2753 = vmatprep.mubr.msk.bf16.mxu1 %vm509_vm1, %v2892_v28 }
 0x168   :  { %2790 = vmatmul.mubr.msk.bf16.gmra.mrb[36].mxu0 %vm509_vm1, %v2891_v22 }
 0x169   :  { %2793 = vmatprep.mubr.msk.bf16.mxu0 %vm509_vm1, %v2892_v28 }
 0x16e   :  { %2754 = vmatmul.mubr.msk.bf16.gmra.mrb[24].mxu1 %vm509_vm1, %v2893_v45 }
 0x16f   :  { %2757 = vmatprep.mubr.msk.bf16.mxu1 %vm509_vm1, %v2894_v56 }
 0x170   :  { %2794 = vmatmul.mubr.msk.bf16.gmra.mrb[40].mxu0 %vm509_vm1, %v2893_v45 }
 0x171   :  { %2797 = vmatprep.mubr.msk.bf16.mxu0 %vm509_vm1, %v2894_v56 }
 0x176   :  { %2758 = vmatmul.mubr.msk.bf16.gmra.mrb[28].mxu1 %vm509_vm1, %v2895_v54 }
 0x178   :  { %2798 = vmatmul.mubr.msk.bf16.gmra.mrb[44].mxu0 %vm509_vm1, %v2895_v54 }
 0x211   :  { %v2731_v60 = vpop.f32.mrb[0].mxu1 }
 0x212   :  { %719 = vrot.lane.b32.xlu0 %v2731_v60, %s2991_s30  ;;  %v3295_v0 = vpop.f32.mrb[1].mxu1 }
 0x213   :  { %v2771_v1 = vpop.f32.mrb[16].mxu0  ;;  %v2732_v2 = vpop.f32.mrb[2].mxu1 }
 0x214   :  { %970 = vrot.lane.b32.xlu1 %v2771_v1, %s2991_s30  ;;  %v3297_v3 = vpop.f32.mrb[17].mxu0  ;;  %v3299_v4 = vpop.f32.mrb[3].mxu1 }
 0x215   :  { %v2772_v5 = vpop.f32.mrb[18].mxu0 }
 0x216   :  { %v3301_v6 = vpop.f32.mrb[19].mxu0  ;;  %721 = vrot.lane.b32.xlu0 %v2732_v2, %s2991_s30  ;;  %v2896_v2 = vld [vmem:[%s3688_s4] sm:$0xff]  }
 0x217   :  { %2801 = vmatprep.subr.bf16.mxu1 %v2896_v2 }
 0x218   :  { %972 = vrot.lane.b32.xlu1 %v2772_v5, %s2991_s30  ;;  %2802 = vmatpush3.bf16.msra.mxu1 %v2896_v2  ;;  %v2897_v5 = vld [vmem:[%s3688_s4 + $0x8] sm:$0xff]   ;;  %s3003_s30 = smov 96  }
 0x219   :  { %v2735_v7 = vpop.f32.mrb[4].mxu1  ;;  %2803 = vmatprep.subr.bf16.mxu1 %v2897_v5 }
 0x21a   :  { %731 = vrot.lane.b32.xlu0 %v2735_v7, %s2992_s3  ;;  %v608_v8 = vpop.f32.mrb[5].mxu1  ;;  %v2898_v7 = vld [vmem:[%s3688_s4 + $0x10] sm:$0xff]  }
 0x21b   :  { %v2775_v9 = vpop.f32.mrb[20].mxu0  ;;  %v2736_v14 = vpop.f32.mrb[6].mxu1 }
 0x21c   :  { %v859_v15 = vpop.f32.mrb[21].mxu0  ;;  %733 = vrot.lane.b32.xlu1 %v2736_v14, %s2992_s3  ;;  %v611_v16 = vpop.f32.mrb[7].mxu1  ;;  %2804 = vmatpush3.bf16.msra.mxu1 %v2897_v5  ;;  %v2901_v14 = vld [vmem:[%s3688_s4 + $0x28] sm:$0xff]  }
 0x21d   :  { %v2776_v17 = vpop.f32.mrb[22].mxu0  ;;  %2805 = vmatprep.subr.bf16.mxu1 %v2898_v7 }
 0x21e   :  { %v862_v18 = vpop.f32.mrb[23].mxu0  ;;  %982 = vrot.lane.b32.xlu0 %v2775_v9, %s2992_s3  ;;  %v2900_v9 = vld [vmem:[%s3688_s4 + $0x20] sm:$0xff]  }
 0x220   :  { %984 = vrot.lane.b32.xlu1 %v2776_v17, %s2992_s3  ;;  %2806 = vmatpush3.bf16.msra.mxu1 %v2898_v7 }
 0x221   :  { %v2739_v19 = vpop.f32.mrb[8].mxu1 }
 0x222   :  { %725 = vrot.lane.b32.xlu0 %v608_v8, %s2993_s13  ;;  %v624_v20 = vpop.f32.mrb[9].mxu1  ;;  %v2899_v8 = vld [vmem:[%s3688_s4 + $0x18] sm:$0xff]  }
 0x223   :  { %v2740_v21 = vpop.f32.mrb[10].mxu1  ;;  %v2779_v23 = vpop.f32.mrb[24].mxu0  ;;  %2807 = vmatprep.subr.bf16.mxu1 %v2899_v8 }
 0x224   :  { %727 = vrot.lane.b32.xlu1 %v611_v16, %s2993_s13  ;;  %v627_v25 = vpop.f32.mrb[11].mxu1  ;;  %v875_v26 = vpop.f32.mrb[25].mxu0  ;;  %2808 = vmatpush3.bf16.msra.mxu1 %v2899_v8  ;;  %v2903_v16 = vld [vmem:[%s3688_s4 + $0x38] sm:$0xff]  }
 0x225   :  { %v2780_v27 = vpop.f32.mrb[26].mxu0  ;;  %2809 = vmatprep.subr.bf16.mxu1 %v2900_v9 }
 0x226   :  { %976 = vrot.lane.b32.xlu0 %v859_v15, %s2993_s13  ;;  %v878_v30 = vpop.f32.mrb[27].mxu0  ;;  %v2902_v15 = vld [vmem:[%s3688_s4 + $0x30] sm:$0xff]  }
 0x228   :  { %978 = vrot.lane.b32.xlu1 %v862_v18, %s2993_s13  ;;  %2810 = vmatpush3.bf16.msra.mxu1 %v2900_v9 }
 0x229   :  { %v2743_v31 = vpop.f32.mrb[12].mxu1  ;;  %2811 = vmatprep.subr.bf16.mxu1 %v2901_v14 }
 0x22a   :  { %743 = vrot.lane.b32.xlu0 %v2739_v19, %s2994_s14  ;;  %v640_v32 = vpop.f32.mrb[13].mxu1 }
 0x22b   :  { %v2744_v33 = vpop.f32.mrb[14].mxu1  ;;  %v2783_v34 = vpop.f32.mrb[28].mxu0 }
 0x22c   :  { %745 = vrot.lane.b32.xlu1 %v2740_v21, %s2994_s14  ;;  %v643_v35 = vpop.f32.mrb[15].mxu1  ;;  %v891_v36 = vpop.f32.mrb[29].mxu0  ;;  %2812 = vmatpush3.bf16.msra.mxu1 %v2901_v14 }
 0x22d   :  { %v2784_v39 = vpop.f32.mrb[30].mxu0  ;;  %2813 = vmatprep.subr.bf16.mxu1 %v2902_v15 }
 0x22e   :  { %994 = vrot.lane.b32.xlu0 %v2779_v23, %s2994_s14  ;;  %v894_v41 = vpop.f32.mrb[31].mxu0 }
 0x230   :  { %996 = vrot.lane.b32.xlu1 %v2780_v27, %s2994_s14  ;;  %2814 = vmatpush3.bf16.msra.mxu1 %v2902_v15 }
 0x231   :  { %v2747_v42 = vpop.f32.mrb[16].mxu1  ;;  %2815 = vmatprep.subr.bf16.mxu1 %v2903_v16 }
 0x232   :  { %737 = vrot.lane.b32.xlu0 %v624_v20, %s2995_s15  ;;  %v656_v43 = vpop.f32.mrb[17].mxu1 }
 0x233   :  { %v2748_v47 = vpop.f32.mrb[18].mxu1  ;;  %v2787_v48 = vpop.f32.mrb[32].mxu0 }
 0x234   :  { %739 = vrot.lane.b32.xlu1 %v627_v25, %s2995_s15  ;;  %v659_v49 = vpop.f32.mrb[19].mxu1  ;;  %v907_v50 = vpop.f32.mrb[33].mxu0  ;;  %2816 = vmatpush3.bf16.msra.mxu1 %v2903_v16 }
 0x235   :  { %v2788_v51 = vpop.f32.mrb[34].mxu0 }
 0x236   :  { %988 = vrot.lane.b32.xlu0 %v875_v26, %s2995_s15  ;;  %v910_v52 = vpop.f32.mrb[35].mxu0 }
 0x238   :  { %990 = vrot.lane.b32.xlu1 %v878_v30, %s2995_s15 }
 0x239   :  { %v2751_v53 = vpop.f32.mrb[20].mxu1 }
 0x23a   :  { %755 = vrot.lane.b32.xlu0 %v2743_v31, %s2996_s16  ;;  %v672_v55 = vpop.f32.mrb[21].mxu1 }
 0x23b   :  { %v2752_v57 = vpop.f32.mrb[22].mxu1  ;;  %v2791_v58 = vpop.f32.mrb[36].mxu0 }
 0x23c   :  { %757 = vrot.lane.b32.xlu1 %v2744_v33, %s2996_s16  ;;  %v675_v59 = vpop.f32.mrb[23].mxu1  ;;  %v923_v62 = vpop.f32.mrb[37].mxu0 }
 0x23d   :  { %v2792_v61 = vpop.f32.mrb[38].mxu0 }
 0x23e   :  { %1006 = vrot.lane.b32.xlu0 %v2783_v34, %s2996_s16  ;;  %v926_v63 = vpop.f32.mrb[39].mxu0 }
 0x240   :  { %1008 = vrot.lane.b32.xlu1 %v2784_v39, %s2996_s16 }
 0x241   :  { %v2755_v11 = vpop.f32.mrb[24].mxu1 }
 0x242   :  { %749 = vrot.lane.b32.xlu0 %v640_v32, %s2997_s17  ;;  %v688_v13 = vpop.f32.mrb[25].mxu1 }
 0x243   :  { %v2756_v40 = vpop.f32.mrb[26].mxu1  ;;  %v2795_v10 = vpop.f32.mrb[40].mxu0 }
 0x244   :  { %751 = vrot.lane.b32.xlu1 %v643_v35, %s2997_s17  ;;  %v691_v12 = vpop.f32.mrb[27].mxu1  ;;  %v939_v38 = vpop.f32.mrb[41].mxu0 }
 0x245   :  { %v2796_v44 = vpop.f32.mrb[42].mxu0 }
 0x246   :  { %1000 = vrot.lane.b32.xlu0 %v891_v36, %s2997_s17  ;;  %v942_v24 = vpop.f32.mrb[43].mxu0 }
 0x248   :  { %1002 = vrot.lane.b32.xlu1 %v894_v41, %s2997_s17 }
 0x249   :  { %v2759_v29 = vpop.f32.mrb[28].mxu1 }
 0x24a   :  { %767 = vrot.lane.b32.xlu0 %v2747_v42, %s2998_s18  ;;  %v704_v22 = vpop.f32.mrb[29].mxu1 }
 0x24b   :  { %v2760_v28 = vpop.f32.mrb[30].mxu1  ;;  %v3315_v45 = vpop.f32.mrb[44].mxu0 }
 0x24c   :  { %769 = vrot.lane.b32.xlu1 %v2748_v47, %s2998_s18  ;;  %v707_v56 = vpop.f32.mrb[31].mxu1  ;;  %v955_v54 = vpop.f32.mrb[45].mxu0 }
 0x24d   :  { %v3317_v60 = vpop.f32.mrb[46].mxu0 }
 0x24e   :  { %1018 = vrot.lane.b32.xlu0 %v2787_v48, %s2998_s18  ;;  %v958_v1 = vpop.f32.mrb[47].mxu0 }
 0x250   :  { %1020 = vrot.lane.b32.xlu1 %v2788_v51, %s2998_s18 }
 0x252   :  { %761 = vrot.lane.b32.xlu0 %v656_v43, %s2999_s19 }
 0x254   :  { %763 = vrot.lane.b32.xlu1 %v659_v49, %s2999_s19 }
 0x256   :  { %1012 = vrot.lane.b32.xlu0 %v907_v50, %s2999_s19 }
 0x258   :  { %1014 = vrot.lane.b32.xlu1 %v910_v52, %s2999_s19 }
 0x25a   :  { %779 = vrot.lane.b32.xlu0 %v2751_v53, %s3000_s20 }
 0x25c   :  { %781 = vrot.lane.b32.xlu1 %v2752_v57, %s3000_s20 }
 0x25e   :  { %1030 = vrot.lane.b32.xlu0 %v2791_v58, %s3000_s20 }
 0x260   :  { %1032 = vrot.lane.b32.xlu1 %v2792_v61, %s3000_s20  ;;  %s3004_s20 = smov 120  }
 0x262   :  { %773 = vrot.lane.b32.xlu0 %v672_v55, %s3001_s22 }
 0x264   :  { %775 = vrot.lane.b32.xlu1 %v675_v59, %s3001_s22 }
 0x266   :  { %1024 = vrot.lane.b32.xlu0 %v923_v62, %s3001_s22 }
 0x268   :  { %1026 = vrot.lane.b32.xlu1 %v926_v63, %s3001_s22 }
 0x26a   :  { %791 = vrot.lane.b32.xlu0 %v2755_v11, %s3002_s26 }
 0x26c   :  { %793 = vrot.lane.b32.xlu1 %v2756_v40, %s3002_s26 }
 0x26e   :  { %1042 = vrot.lane.b32.xlu0 %v2795_v10, %s3002_s26 }
 0x270   :  { %1044 = vrot.lane.b32.xlu1 %v2796_v44, %s3002_s26 }
 0x272   :  { %785 = vrot.lane.b32.xlu0 %v688_v13, %s3003_s30 }
 0x274   :  { %787 = vrot.lane.b32.xlu1 %v691_v12, %s3003_s30 }
 0x276   :  { %1036 = vrot.lane.b32.xlu0 %v939_v38, %s3003_s30 }
 0x278   :  { %1038 = vrot.lane.b32.xlu1 %v942_v24, %s3003_s30 }
 0x27a   :  { %803 = vrot.lane.b32.xlu0 %v2759_v29, %s3004_s20 }
 0x27c   :  { %805 = vrot.lane.b32.xlu1 %v2760_v28, %s3004_s20 }
 0x27e   :  { %797 = vrot.lane.b32.xlu0 %v704_v22, %s3005_s2 }
 0x280   :  { %799 = vrot.lane.b32.xlu1 %v707_v56, %s3005_s2 }
 0x282   :  { %1048 = vrot.lane.b32.xlu0 %v955_v54, %s3005_s2 }
 0x284   :  { %v720_v17 = vpop.permute.xlu0 %719  ;;  %1050 = vrot.lane.b32.xlu1 %v958_v1, %s3005_s2 }
 0x285   :  { %v723_v44 = vadd.f32 %v720_v17, %v3295_v0 }
 0x286   :  { %v971_v18 = vpop.permute.xlu1 %970  ;;  %1054 = vrot.lane.b32.xlu0 %v3315_v45, %s3004_s20 }
 0x287   :  { %v974_v1 = vadd.f32 %v971_v18, %v3297_v3 }
 0x288   :  { %v722_v19 = vpop.permute.xlu0 %721  ;;  %1056 = vrot.lane.b32.xlu1 %v3317_v60, %s3004_s20 }
 0x289   :  { %v724_v29 = vadd.f32 %v722_v19, %v3299_v4 }
 0x28a   :  { %v973_v20 = vpop.permute.xlu1 %972 }
 0x28b   :  { %v975_v39 = vadd.f32 %v973_v20, %v3301_v6 }
 0x28c   :  { %v732_v21 = vpop.permute.xlu0 %731 }
 0x28e   :  { %v734_v23 = vpop.permute.xlu1 %733 }
 0x290   :  { %v983_v25 = vpop.permute.xlu0 %982 }
 0x292   :  { %v985_v26 = vpop.permute.xlu1 %984 }
 0x294   :  { %v726_v27 = vpop.permute.xlu0 %725 }
 0x295   :  { %v729_v22 = vadd.f32 %v726_v27, %v723_v44 }
 0x296   :  { %v728_v30 = vpop.permute.xlu1 %727 }
 0x297   :  { %v730_v45 = vadd.f32 %v728_v30, %v724_v29  ;;  %v735_v54 = vadd.f32 %v732_v21, %v729_v22 }
 0x298   :  { %v977_v31 = vpop.permute.xlu0 %976 }
 0x299   :  { %v736_v5 = vadd.f32 %v734_v23, %v730_v45  ;;  %v980_v8 = vadd.f32 %v977_v31, %v974_v1 }
 0x29a   :  { %v979_v32 = vpop.permute.xlu1 %978 }
 0x29b   :  { %v981_v42 = vadd.f32 %v979_v32, %v975_v39  ;;  %v986_v0 = vadd.f32 %v983_v25, %v980_v8 }
 0x29c   :  { %v744_v33 = vpop.permute.xlu0 %743 }
 0x29d   :  { %v987_v48 = vadd.f32 %v985_v26, %v981_v42 }
 0x29e   :  { %v746_v34 = vpop.permute.xlu1 %745 }
 0x2a0   :  { %v995_v35 = vpop.permute.xlu0 %994 }
 0x2a2   :  { %v997_v36 = vpop.permute.xlu1 %996 }
 0x2a4   :  { %v738_v41 = vpop.permute.xlu0 %737 }
 0x2a5   :  { %v741_v2 = vadd.f32 %v738_v41, %v735_v54 }
 0x2a6   :  { %v740_v43 = vpop.permute.xlu1 %739 }
 0x2a7   :  { %v742_v9 = vadd.f32 %v740_v43, %v736_v5  ;;  %v747_v15 = vadd.f32 %v744_v33, %v741_v2 }
 0x2a8   :  { %v989_v47 = vpop.permute.xlu0 %988 }
 0x2a9   :  { %v748_v20 = vadd.f32 %v746_v34, %v742_v9  ;;  %v992_v19 = vadd.f32 %v989_v47, %v986_v0 }
 0x2aa   :  { %v991_v49 = vpop.permute.xlu1 %990 }
 0x2ab   :  { %v993_v50 = vadd.f32 %v991_v49, %v987_v48  ;;  %v998_v32 = vadd.f32 %v995_v35, %v992_v19 }
 0x2ac   :  { %v756_v51 = vpop.permute.xlu0 %755 }
 0x2ad   :  { %v999_v52 = vadd.f32 %v997_v36, %v993_v50 }
 0x2ae   :  { %v758_v53 = vpop.permute.xlu1 %757 }
 0x2b0   :  { %v1007_v55 = vpop.permute.xlu0 %1006 }
 0x2b2   :  { %v1009_v57 = vpop.permute.xlu1 %1008 }
 0x2b4   :  { %v750_v58 = vpop.permute.xlu0 %749 }
 0x2b5   :  { %v753_v17 = vadd.f32 %v750_v58, %v747_v15 }
 0x2b6   :  { %v752_v59 = vpop.permute.xlu1 %751 }
 0x2b7   :  { %v754_v26 = vadd.f32 %v752_v59, %v748_v20  ;;  %v759_v30 = vadd.f32 %v756_v51, %v753_v17  ;;  %v2904_v17 = vld [vmem:[%s3690_s6] sm:$0xff]  }
 0x2b8   :  { %v1001_v62 = vpop.permute.xlu0 %1000  ;;  %2833 = vmatprep.mubr.msk.bf16.mxu0 %vm107_vm0, %v2904_v17 }
 0x2b9   :  { %v760_v3 = vadd.f32 %v758_v53, %v754_v26  ;;  %v1004_v23 = vadd.f32 %v1001_v62, %v998_v32 }
 0x2ba   :  { %v1003_v61 = vpop.permute.xlu1 %1002 }
 0x2bb   :  { %v1005_v39 = vadd.f32 %v1003_v61, %v999_v52  ;;  %v1010_v43 = vadd.f32 %v1007_v55, %v1004_v23 }
 0x2bc   :  { %v768_v63 = vpop.permute.xlu0 %767 }
 0x2bd   :  { %v1011_v25 = vadd.f32 %v1009_v57, %v1005_v39 }
 0x2be   :  { %v770_v11 = vpop.permute.xlu1 %769 }
 0x2c0   :  { %v1019_v13 = vpop.permute.xlu0 %1018 }
 0x2c2   :  { %v1021_v6 = vpop.permute.xlu1 %1020 }
 0x2c4   :  { %v762_v40 = vpop.permute.xlu0 %761 }
 0x2c5   :  { %v765_v36 = vadd.f32 %v762_v40, %v759_v30 }
 0x2c6   :  { %v764_v10 = vpop.permute.xlu1 %763 }
 0x2c7   :  { %v766_v31 = vadd.f32 %v764_v10, %v760_v3  ;;  %v771_v42 = vadd.f32 %v768_v63, %v765_v36 }
 0x2c8   :  { %v1013_v12 = vpop.permute.xlu0 %1012 }
 0x2c9   :  { %v772_v34 = vadd.f32 %v770_v11, %v766_v31  ;;  %v1016_v47 = vadd.f32 %v1013_v12, %v1010_v43 }
 0x2ca   :  { %v1015_v38 = vpop.permute.xlu1 %1014 }
 0x2cb   :  { %v1017_v50 = vadd.f32 %v1015_v38, %v1011_v25  ;;  %v1022_v40 = vadd.f32 %v1019_v13, %v1016_v47 }
 0x2cc   :  { %v780_v24 = vpop.permute.xlu0 %779 }
 0x2cd   :  { %v1023_v53 = vadd.f32 %v1021_v6, %v1017_v50 }
 0x2ce   :  { %v782_v28 = vpop.permute.xlu1 %781 }
 0x2d0   :  { %v1031_v56 = vpop.permute.xlu0 %1030 }
 0x2d2   :  { %v1033_v60 = vpop.permute.xlu1 %1032 }
 0x2d4   :  { %v774_v7 = vpop.permute.xlu0 %773 }
 0x2d5   :  { %v777_v48 = vadd.f32 %v774_v7, %v771_v42 }
 0x2d6   :  { %v776_v14 = vpop.permute.xlu1 %775 }
 0x2d7   :  { %v778_v58 = vadd.f32 %v776_v14, %v772_v34  ;;  %v783_v59 = vadd.f32 %v780_v24, %v777_v48 }
 0x2d8   :  { %v1025_v16 = vpop.permute.xlu0 %1024 }
 0x2d9   :  { %v784_v62 = vadd.f32 %v782_v28, %v778_v58  ;;  %v1028_v61 = vadd.f32 %v1025_v16, %v1022_v40 }
 0x2da   :  { %v1027_v4 = vpop.permute.xlu1 %1026 }
 0x2db   :  { %v1029_v10 = vadd.f32 %v1027_v4, %v1023_v53  ;;  %v1034_v22 = vadd.f32 %v1031_v56, %v1028_v61 }
 0x2dc   :  { %v792_v27 = vpop.permute.xlu0 %791 }
 0x2dd   :  { %v1035_v11 = vadd.f32 %v1033_v60, %v1029_v10 }
 0x2de   :  { %v794_v21 = vpop.permute.xlu1 %793 }
 0x2e0   :  { %v1043_v18 = vpop.permute.xlu0 %1042 }
 0x2e2   :  { %v1045_v41 = vpop.permute.xlu1 %1044 }
 0x2e4   :  { %v786_v33 = vpop.permute.xlu0 %785 }
 0x2e5   :  { %v789_v44 = vadd.f32 %v786_v33, %v783_v59 }
 0x2e6   :  { %v788_v49 = vpop.permute.xlu1 %787 }
 0x2e7   :  { %v790_v63 = vadd.f32 %v788_v49, %v784_v62  ;;  %v795_v55 = vadd.f32 %v792_v27, %v789_v44 }
 0x2e8   :  { %v1037_v51 = vpop.permute.xlu0 %1036 }
 0x2e9   :  { %v796_v12 = vadd.f32 %v794_v21, %v790_v63  ;;  %v1040_v54 = vadd.f32 %v1037_v51, %v1034_v22 }
 0x2ea   :  { %v1039_v35 = vpop.permute.xlu1 %1038 }
 0x2eb   :  { %v1041_v1 = vadd.f32 %v1039_v35, %v1035_v11  ;;  %v1046_v28 = vadd.f32 %v1043_v18, %v1040_v54 }
 0x2ec   :  { %v804_v52 = vpop.permute.xlu0 %803 }
 0x2ed   :  { %v1047_v7 = vadd.f32 %v1045_v41, %v1041_v1 }
 0x2ee   :  { %v806_v29 = vpop.permute.xlu1 %805 }
 0x2f0   :  { %v798_v57 = vpop.permute.xlu0 %797 }
 0x2f1   :  { %v801_v45 = vadd.f32 %v798_v57, %v795_v55 }
 0x2f2   :  { %v800_v38 = vpop.permute.xlu1 %799 }
 0x2f3   :  { %v802_v24 = vadd.f32 %v800_v38, %v796_v12  ;;  %v807_v13 = vadd.f32 %v804_v52, %v801_v45  ;;  %v1175_v52 = vld [vmem:[%s3689_s5] sm:$0x3] }
 0x2f4   :  { %v1049_v2 = vpop.permute.xlu0 %1048 }
 0x2f5   :  { %v808_v6 = vadd.f32 %v806_v29, %v802_v24  ;;  %v1052_v14 = vadd.f32 %v1049_v2, %v1046_v28 }
 0x2f6   :  { %v1051_v5 = vpop.permute.xlu1 %1050 }
 0x2f7   :  { %v1060_v8 = vpack.c.bf16 %v808_v6, %v807_v13  ;;  %v1053_v15 = vadd.f32 %v1051_v5, %v1047_v7 }
 0x2f8   :  { %v1055_v9 = vpop.permute.xlu0 %1054 }
 0x2f9   :  { %2817 = vmatprep.mubr.bf16.mxu1 %v1060_v8  ;;  %v1058_v56 = vadd.f32 %v1055_v9, %v1052_v14 }
 0x2fa   :  { %v1057_v16 = vpop.permute.xlu1 %1056 }
 0x2fb   :  { %v1059_v60 = vadd.f32 %v1057_v16, %v1053_v15 }
 0x2fd   :  { %v1061_v0 = vpack.c.bf16 %v1059_v60, %v1058_v56  ;;  %v2905_v56 = vld [vmem:[%s3690_s6 + $0x8] sm:$0xff]   ;;  %v2906_v60 = vld [vmem:[%s3690_s6 + $0x10] sm:$0xff]  }
 0x2ff   :  { %2818 = vmatmul.mubr.bf16.vlgmr.msra.gmra.mrb[32].mxu1 %v1061_v0  ;;  %v2907_v0 = vld [vmem:[%s3690_s6 + $0x18] sm:$0xff]  }
 0x300   :  { %2823 = vmatprep.mubr.msk.bf16.mxu1 %vm107_vm0, %v2904_v17 }
 0x3d2   :  { %v2819_v20 = vpop.f32.mrb[32].mxu1 }
 0x3d3   :  { %v1160_v4 = vpop.f32.mrb[33].mxu1  ;;  %v1187_v32 = vmul.f32 %v2819_v20, %v2819_v20 }
 0x3d4   :  { %v2820_v19 = vpop.f32.mrb[34].mxu1  ;;  %v1185_v27 = vmul.f32 %v1160_v4, %v1160_v4 }
 0x3d5   :  { %v1163_v26 = vpop.f32.mrb[35].mxu1  ;;  %v1188_v18 = vmul.f32 %v2820_v19, %v2820_v19 }
 0x3d6   :  { %v1176_v30 = vadd.f32 %v1163_v26, %v1160_v4  ;;  %v1186_v21 = vmul.f32 %v1163_v26, %v1163_v26 }
 0x3d8   :  { %v1177_v36 = vadd.f32 %v2819_v20, %v1176_v30  ;;  %v1189_v3 = vadd.f32 %v1186_v21, %v1185_v27 }
 0x3da   :  { %v1178_v23 = vadd.f32 %v2820_v19, %v1177_v36  ;;  %v1190_v39 = vadd.f32 %v1189_v3, %v1187_v32 }
 0x3dc   :  { %v1179_v31 = vrot.slane %v1178_v23, 4  ;;  %v1191_v41 = vadd.f32 %v1190_v39, %v1188_v18 }
 0x3de   :  { %v1180_v42 = vadd.f32 %v1179_v31, %v1178_v23  ;;  %v1192_v33 = vrot.slane %v1191_v41, 4 }
 0x3e0   :  { %v1181_v43 = vrot.slane %v1180_v42, 2  ;;  %v1193_v25 = vadd.f32 %v1192_v33, %v1191_v41 }
 0x3e2   :  { %v1182_v48 = vadd.f32 %v1181_v43, %v1180_v42  ;;  %v1194_v34 = vrot.slane %v1193_v25, 2 }
 0x3e4   :  { %v1183_v49 = vrot.slane %v1182_v48, 1  ;;  %v1195_v47 = vadd.f32 %v1194_v34, %v1193_v25 }
 0x3e6   :  { %v1184_v50 = vadd.f32 %v1183_v49, %v1182_v48  ;;  %v1196_v58 = vrot.slane %v1195_v47, 1  ;;  %v2908_v48 = vld [vmem:[%s3691_s7 + $0x40] sm:$0xff]  }
 0x3e7   :  { %v2909_v49 = vld [vmem:[%s3691_s7] sm:$0xff]  }
 0x3e8   :  { %v1197_v51 = vadd.f32 %v1196_v58, %v1195_v47  ;;  %v1198_v59 = vmul.f32 0.03125, %v1184_v50  ;;  %v2910_v47 = vld [vmem:[%s3691_s7 + $0x48] sm:$0xff]  }
 0x3e9   :  { %v2911_v58 = vld [vmem:[%s3691_s7 + $0x8] sm:$0xff]  }
 0x3ea   :  { %v1199_v35 = vmul.f32 0.03125, %v1197_v51  ;;  %v1200_v40 = vmul.f32 %v1198_v59, %v1198_v59  ;;  %v2912_v51 = vld [vmem:[%s3691_s7 + $0x50] sm:$0xff]  }
 0x3ec   :  { %v1201_v53 = vsub.f32 %v1199_v35, %v1200_v40  ;;  %v2913_v35 = vld [vmem:[%s3691_s7 + $0x10] sm:$0xff]   ;;  %v2914_v40 = vld [vmem:[%s3691_s7 + $0x58] sm:$0xff]  }
 0x3ee   :  { %v1202_v44 = vmax.f32 %v1201_v53, 0.0 }
 0x3f0   :  { %v1203_v62 = vadd.f32 1e-05, %v1202_v44 }
 0x3f2   :  { %2959 = vrsqrt.f32 %v1203_v62  ;;  %v2915_v62 = vld [vmem:[%s3691_s7 + $0x18] sm:$0xff]  }
 0x3fc   :  { %v2960_v61 = vpop.eup %2959 }
 0x3fd   :  { %v1205_v10 = vmul.f32 %v2960_v61, %v1175_v52 }
 0x3ff   :  { %v1206_v63 = vmul.f32 %v1205_v10, %v1198_v59  ;;  %v1214_v29 = vrot.slane %v1205_v10, %v3177_v37  ;;  %v2917_v10 = vld [vmem:[%s3691_s7 + $0x20] sm:$0xff]  }
 0x401   :  { %v1208_v55 = vrot.slane %v1206_v63, 7  ;;  %v1216_v57 = vmul.f32 %v1214_v29, %v1163_v26  ;;  %v1215_v22 = vmul.f32 %v1214_v29, %v1160_v4  ;;  %v1217_v11 = vmul.f32 %v2819_v20, %v1214_v29  ;;  %v2918_v63 = vld [vmem:[%s3691_s7 + $0x68] sm:$0xff]  }
 0x402   :  { %v1218_v45 = vmul.f32 %v2820_v19, %v1214_v29 }
 0x403   :  { %v1210_v12 = vsub.f32 %v1175_v52, %v1208_v55  ;;  %v2916_v52 = vld [vmem:[%s3691_s7 + $0x60] sm:$0xff]   ;;  %v2919_v55 = vld [vmem:[%s3691_s7 + $0x28] sm:$0xff]  }
 0x405   :  { %v1222_v38 = vrot.slane %v1210_v12, %v3180_v46  ;;  %v2922_v12 = vld [vmem:[%s3691_s7 + $0x78] sm:$0xff]  }
 0x407   :  { %v1224_v54 = vadd.f32 %v1222_v38, %v1216_v57  ;;  %v1223_v1 = vadd.f32 %v1222_v38, %v1215_v22  ;;  %v1225_v24 = vadd.f32 %v1222_v38, %v1217_v11  ;;  %v1226_v2 = vadd.f32 %v1222_v38, %v1218_v45  ;;  %v2920_v57 = vld [vmem:[%s3691_s7 + $0x70] sm:$0xff]  }
 0x408   :  { %v2921_v45 = vld [vmem:[%s3691_s7 + $0x30] sm:$0xff]  }
 0x409   :  { %vm1227_vm1 = vcmp.gt.f32.partialorder %v1223_v1, 0.0  ;;  %vm1228_vm4 = vcmp.gt.f32.partialorder %v1224_v54, 0.0  ;;  %v1231_v13 = vmul.f32 0.2, %v1223_v1  ;;  %v1232_v6 = vmul.f32 0.2, %v1224_v54 }
 0x40a   :  { %vm1229_vm5 = vcmp.gt.f32.partialorder %v1225_v24, 0.0  ;;  %vm1230_vm6 = vcmp.gt.f32.partialorder %v1226_v2, 0.0  ;;  %v1233_v5 = vmul.f32 0.2, %v1225_v24  ;;  %v1234_v28 = vmul.f32 0.2, %v1226_v2 }
 0x40b   :  { %v1235_v7 = vsel %vm1227_vm1, %v1223_v1, %v1231_v13  ;;  %v1236_v8 = vsel %vm1228_vm4, %v1224_v54, %v1232_v6  ;;  %v2923_v54 = vld [vmem:[%s3691_s7 + $0x38] sm:$0xff]  }
 0x40c   :  { %v1239_v9 = vpack.c.bf16 %v1236_v8, %v1235_v7  ;;  %v1237_v14 = vsel %vm1229_vm5, %v1225_v24, %v1233_v5  ;;  %v1238_v15 = vsel %vm1230_vm6, %v1226_v2, %v1234_v28 }
 0x40d   :  { %v1240_v16 = vpack.c.bf16 %v1238_v15, %v1237_v14 }
 0x40e   :  { %2821 = vmatprep.subr.bf16.mxu1 %v1239_v9 }
 0x40f   :  { %2831 = vmatprep.subr.bf16.mxu0 %v1240_v16  ;;  %2822 = vmatpush3.bf16.msra.mxu1 %v1239_v9 }
 0x410   :  { %2832 = vmatpush3.bf16.msra.mxu0 %v1240_v16  ;;  %2633 = vmatprep.subr.bf16.mxu1 %v2908_v48 }
 0x412   :  { %2824 = vmatmul.mubr.msk.bf16.vlgmr.msra.gmra.mrb[36].mxu1 %vm107_vm0, %v2905_v56 }
 0x413   :  { %2834 = vmatmul.mubr.msk.bf16.vlgmr.msra.gmra.mrb[48].mxu0 %vm107_vm0, %v2905_v56  ;;  %2827 = vmatprep.mubr.msk.bf16.mxu1 %vm107_vm0, %v2906_v60 }
 0x414   :  { %2837 = vmatprep.mubr.msk.bf16.mxu0 %vm107_vm0, %v2906_v60  ;;  %2634 = vmatpush3.bf16.msra.mxu1 %v2909_v49 }
 0x415   :  { %2635 = vmatprep.subr.bf16.mxu1 %v2910_v47 }
 0x418   :  { %2636 = vmatpush3.bf16.msra.mxu1 %v2911_v58 }
 0x419   :  { %2637 = vmatprep.subr.bf16.mxu1 %v2912_v51 }
 0x41a   :  { %2828 = vmatmul.mubr.msk.bf16.gmra.mrb[40].mxu1 %vm107_vm0, %v2907_v0 }
 0x41b   :  { %2838 = vmatmul.mubr.msk.bf16.gmra.mrb[52].mxu0 %vm107_vm0, %v2907_v0  ;;  %vm1549_vm0 = vcmask 1043456  }
 0x41c   :  { %2638 = vmatpush3.bf16.msra.mxu1 %v2913_v35 }
 0x41d   :  { %2639 = vmatprep.subr.bf16.mxu1 %v2914_v40 }
 0x420   :  { %2640 = vmatpush3.bf16.msra.mxu1 %v2915_v62 }
 0x421   :  { %2641 = vmatprep.subr.bf16.mxu1 %v2916_v52 }
 0x424   :  { %2642 = vmatpush3.bf16.msra.mxu1 %v2917_v10 }
 0x425   :  { %2643 = vmatprep.subr.bf16.mxu1 %v2918_v63 }
 0x428   :  { %2644 = vmatpush3.bf16.msra.mxu1 %v2919_v55 }
 0x429   :  { %2645 = vmatprep.subr.bf16.mxu1 %v2920_v57 }
 0x42c   :  { %2646 = vmatpush3.bf16.msra.mxu1 %v2921_v45 }
 0x42d   :  { %2647 = vmatprep.subr.bf16.mxu1 %v2922_v12 }
 0x430   :  { %2648 = vmatpush3.bf16.msra.mxu1 %v2923_v54 }
 0x4e5   :  { %v2825_v17 = vpop.f32.mrb[36].mxu1 }
 0x4e6   :  { %v2835_v20 = vpop.f32.mrb[48].mxu0  ;;  %1361 = vrot.lane.b32.xlu0 %v2825_v17, %s2999_s19  ;;  %v3391_v4 = vpop.f32.mrb[37].mxu1  ;;  %v1365_v30 = vrot.slane %v2825_v17, 4 }
 0x4e7   :  { %v1496_v19 = vrot.slane %v2835_v20, 4  ;;  %1492 = vrot.lane.b32.xlu1 %v2835_v20, %s2999_s19  ;;  %v3394_v26 = vpop.f32.mrb[49].mxu0  ;;  %v3396_v27 = vpop.f32.mrb[38].mxu1  ;;  %v1347_v3 = vrot.slane %v3391_v4, 4 }
 0x4e8   :  { %v3398_v21 = vpop.f32.mrb[50].mxu0  ;;  %v1318_v32 = vpop.f32.mrb[39].mxu1  ;;  %v1478_v43 = vrot.slane %v3394_v26, 4  ;;  %v1374_v24 = vrot.slane %v3396_v27, 4 }
 0x4e9   :  { %v1449_v36 = vpop.f32.mrb[51].mxu0  ;;  %v1356_v34 = vrot.slane %v1318_v32, 4  ;;  %v1505_v38 = vrot.slane %v3398_v21, 4 }
 0x4ea   :  { %1367 = vrot.lane.b32.xlu0 %v1365_v30, %s3001_s22  ;;  %v1487_v50 = vrot.slane %v1449_v36, 4 }
 0x4eb   :  { %1498 = vrot.lane.b32.xlu1 %v1496_v19, %s3001_s22 }
 0x4ed   :  { %v2829_v18 = vpop.f32.mrb[40].mxu1 }
 0x4ee   :  { %1349 = vrot.lane.b32.xlu0 %v1347_v3, %s2993_s13  ;;  %v2839_v23 = vpop.f32.mrb[52].mxu0  ;;  %v3404_v39 = vpop.f32.mrb[41].mxu1  ;;  %v1398_v59 = vrot.slane %v2829_v18, 4 }
 0x4ef   :  { %1501 = vrot.lane.b32.xlu1 %v3398_v21, %s3003_s30  ;;  %v3408_v31 = vpop.f32.mrb[42].mxu1  ;;  %v3410_v41 = vpop.f32.mrb[53].mxu0  ;;  %v1529_v53 = vrot.slane %v2839_v23, 4  ;;  %v1380_v61 = vrot.slane %v3404_v39, 4 }
 0x4f0   :  { %v2840_v42 = vpop.f32.mrb[54].mxu0  ;;  %v1334_v33 = vpop.f32.mrb[43].mxu1  ;;  %v1511_v44 = vrot.slane %v3410_v41, 4  ;;  %v1407_v1 = vrot.slane %v3408_v31, 4 }
 0x4f1   :  { %v1465_v25 = vpop.f32.mrb[55].mxu0  ;;  %v1389_v22 = vrot.slane %v1334_v33, 4  ;;  %v1538_v11 = vrot.slane %v2840_v42, 4 }
 0x4f2   :  { %1352 = vrot.lane.b32.xlu0 %v1318_v32, %s2995_s15  ;;  %v1520_v29 = vrot.slane %v1465_v25, 4 }
 0x4f3   :  { %1480 = vrot.lane.b32.xlu1 %v1478_v43, %s2993_s13 }
 0x4f6   :  { %1358 = vrot.lane.b32.xlu0 %v1356_v34, %s2997_s17 }
 0x4f7   :  { %1483 = vrot.lane.b32.xlu1 %v1449_v36, %s2995_s15 }
 0x4fa   :  { %1394 = vrot.lane.b32.xlu0 %v2829_v18, %s2999_s19 }
 0x4fb   :  { %1489 = vrot.lane.b32.xlu1 %v1487_v50, %s2997_s17 }
 0x4fe   :  { %1400 = vrot.lane.b32.xlu0 %v1398_v59, %s3001_s22 }
 0x4ff   :  { %1525 = vrot.lane.b32.xlu1 %v2839_v23, %s2999_s19 }
 0x502   :  { %1403 = vrot.lane.b32.xlu0 %v3408_v31, %s3003_s30 }
 0x503   :  { %1531 = vrot.lane.b32.xlu1 %v1529_v53, %s3001_s22 }
 0x506   :  { %1513 = vrot.lane.b32.xlu0 %v1511_v44, %s2993_s13 }
 0x507   :  { %1534 = vrot.lane.b32.xlu1 %v2840_v42, %s3003_s30 }
 0x50a   :  { %1382 = vrot.lane.b32.xlu0 %v1380_v61, %s2993_s13  ;;  %s3008_s13 = smov [#allocation2]  }
 0x50b   :  { %1516 = vrot.lane.b32.xlu1 %v1465_v25, %s2995_s15  ;;  %s2416_s20 = sshll.u32 %s3008_s13, 4  ;;  %s2417_s20 = int_to_ptr.vmem [resolvable:$true] %s2416_s20 }
 0x50c   :  { %s2971_s21 = scalar_lea.vmem %s2417_s20, 32  ;;  %p2972_p1 = scmp.lt.s32.totalorder %s2417_s20, %s2417_s20 }
 0x50e   :  { %1385 = vrot.lane.b32.xlu0 %v1334_v33, %s2995_s15 }
 0x50f   :  { %1522 = vrot.lane.b32.xlu1 %v1520_v29, %s2997_s17 }
 0x512   :  { %1391 = vrot.lane.b32.xlu0 %v1389_v22, %s2997_s17 }
 0x513   :  { %1540 = vrot.lane.b32.xlu1 %v1538_v11, %s3005_s2 }
 0x516   :  { %1370 = vrot.lane.b32.xlu0 %v3396_v27, %s3003_s30 }
 0x517   :  { %1507 = vrot.lane.b32.xlu1 %v1505_v38, %s3005_s2 }
 0x51a   :  { %1409 = vrot.lane.b32.xlu0 %v1407_v1, %s3005_s2 }
 0x51b   :  { %1376 = vrot.lane.b32.xlu1 %v1374_v24, %s3005_s2 }
 0x558   :  { %v1362_v2 = vpop.permute.xlu0 %1361 }
 0x559   :  { %v1493_v13 = vpop.permute.xlu1 %1492 }
 0x55c   :  { %v1368_v6 = vpop.permute.xlu0 %1367 }
 0x55d   :  { %v1499_v5 = vpop.permute.xlu1 %1498 }
 0x560   :  { %v1350_v28 = vpop.permute.xlu0 %1349 }
 0x561   :  { %v1502_v7 = vpop.permute.xlu1 %1501  ;;  %v1351_v18 = vadd.f32 %v1350_v28, %v3391_v4 }
 0x564   :  { %v1353_v8 = vpop.permute.xlu0 %1352 }
 0x565   :  { %v1481_v9 = vpop.permute.xlu1 %1480  ;;  %v1354_v31 = vadd.f32 %v1353_v8, %v1351_v18 }
 0x566   :  { %v1482_v19 = vadd.f32 %v1481_v9, %v3394_v26 }
 0x568   :  { %v1359_v14 = vpop.permute.xlu0 %1358 }
 0x569   :  { %v1484_v15 = vpop.permute.xlu1 %1483  ;;  %v1360_v34 = vadd.f32 %v1359_v14, %v1354_v31  ;;  %v1722_v31 = vld [vmem:[%s3692_s8] sm:$0x3] }
 0x56a   :  { %v1485_v21 = vadd.f32 %v1484_v15, %v1482_v19 }
 0x56b   :  { %v1363_v35 = vadd.f32 %v1362_v2, %v1360_v34  ;;  %v3006_v2 = vmov 0.0  }
 0x56c   :  { %v1395_v16 = vpop.permute.xlu0 %1394  ;;  %2841 = vmatprep.subr.bf16.mxu0 %v3006_v2  ;;  %2843 = vmatprep.mubr.msk.bf16.mxu0 %vm3007_vm7, %v3006_v2 }
 0x56d   :  { %v1490_v56 = vpop.permute.xlu1 %1489 }
 0x56e   :  { %v1491_v32 = vadd.f32 %v1490_v56, %v1485_v21 }
 0x570   :  { %v1401_v60 = vpop.permute.xlu0 %1400  ;;  %v1494_v42 = vadd.f32 %v1493_v13, %v1491_v32 }
 0x571   :  { %v1526_v0 = vpop.permute.xlu1 %1525 }
 0x572   :  { %v1500_v58 = vadd.f32 %v1499_v5, %v1494_v42 }
 0x574   :  { %v1404_v17 = vpop.permute.xlu0 %1403 }
 0x575   :  { %v1532_v20 = vpop.permute.xlu1 %1531 }
 0x578   :  { %v1514_v27 = vpop.permute.xlu0 %1513 }
 0x579   :  { %v1535_v30 = vpop.permute.xlu1 %1534  ;;  %v1515_v23 = vadd.f32 %v1514_v27, %v3410_v41  ;;  %v1503_v41 = vadd.f32 %v1502_v7, %v1500_v58 }
 0x57c   :  { %v1383_v36 = vpop.permute.xlu0 %1382 }
 0x57d   :  { %v1517_v3 = vpop.permute.xlu1 %1516  ;;  %v1384_v25 = vadd.f32 %v1383_v36, %v3404_v39  ;;  %v1369_v39 = vadd.f32 %v1368_v6, %v1363_v35  ;;  %v2924_v35 = vld [vmem:[%s3693_s9] sm:$0xff]  }
 0x57e   :  { %v1518_v33 = vadd.f32 %v1517_v3, %v1515_v23 }
 0x580   :  { %v1386_v43 = vpop.permute.xlu0 %1385 }
 0x581   :  { %v1523_v48 = vpop.permute.xlu1 %1522  ;;  %v1387_v26 = vadd.f32 %v1386_v43, %v1384_v25 }
 0x582   :  { %v1524_v49 = vadd.f32 %v1523_v48, %v1518_v33 }
 0x584   :  { %v1527_v47 = vadd.f32 %v1526_v0, %v1524_v49  ;;  %v1392_v50 = vpop.permute.xlu0 %1391 }
 0x585   :  { %v1541_v51 = vpop.permute.xlu1 %1540  ;;  %v1393_v59 = vadd.f32 %v1392_v50, %v1387_v26 }
 0x586   :  { %v1533_v40 = vadd.f32 %v1532_v20, %v1527_v47 }
 0x587   :  { %v1396_v4 = vadd.f32 %v1395_v16, %v1393_v59 }
 0x588   :  { %v1536_v53 = vadd.f32 %v1535_v30, %v1533_v40  ;;  %v1371_v44 = vpop.permute.xlu0 %1370 }
 0x589   :  { %v1508_v62 = vpop.permute.xlu1 %1507  ;;  %v1402_v52 = vadd.f32 %v1401_v60, %v1396_v4  ;;  %v1372_v29 = vadd.f32 %v1371_v44, %v1369_v39 }
 0x58a   :  { %v1542_v61 = vadd.f32 %v1541_v51, %v1536_v53  ;;  %v1509_v10 = vadd.f32 %v1508_v62, %v1503_v41 }
 0x58b   :  { %v1405_v63 = vadd.f32 %v1404_v17, %v1402_v52  ;;  %v2925_v52 = vld [vmem:[%s3694_s10 + $0x40] sm:$0xff]  }
 0x58c   :  { %v1410_v55 = vpop.permute.xlu0 %1409  ;;  %v1546_v57 = vrot.slane %v1542_v61, 4  ;;  %v1545_v45 = vrot.slane %v1509_v10, 4  ;;  %v2926_v61 = vld [vmem:[%s3694_s10] sm:$0xff]   ;;  %2659 = vmatprep.subr.bf16.mxu1 %v2925_v52 }
 0x58d   :  { %v1377_v22 = vpop.permute.xlu1 %1376  ;;  %v1411_v11 = vadd.f32 %v1410_v55, %v1405_v63 }
 0x58e   :  { %v1378_v12 = vadd.f32 %v1377_v22, %v1372_v29 }
 0x58f   :  { %v1551_v38 = vsel %vm1549_vm0, %v1411_v11, %v1546_v57  ;;  %v2927_v11 = vld [vmem:[%s3694_s10 + $0x48] sm:$0xff]  }
 0x590   :  { %v1550_v54 = vsel %vm1549_vm0, %v1378_v12, %v1545_v45  ;;  %v1553_v1 = vpack.c.bf16 %v1551_v38, %v1551_v38  ;;  %v2928_v45 = vld [vmem:[%s3694_s10 + $0x8] sm:$0xff]   ;;  %v2929_v12 = vld [vmem:[%s3694_s10 + $0xc0] sm:$0xff]  }
 0x591   :  { %v1552_v24 = vpack.c.bf16 %v1550_v54, %v1550_v54 }
 0x592   :  { %1714 = vmatprep.mubr.bf16.mxu1 %v1553_v1 }
 0x593   :  { %1715 = vmatmul.mubr.bf16.vlgmr.msra.gmra.mrb[44].mxu1 %v1552_v24 }
 0x594   :  { %2660 = vmatpush3.bf16.msra.mxu1 %v2926_v61 }
 0x595   :  { %2661 = vmatprep.subr.bf16.mxu1 %v2927_v11 }
 0x598   :  { %2662 = vmatpush3.bf16.msra.mxu1 %v2928_v45 }
 0x666   :  { %v2649_v13 = vpop.f32.mrb[44].mxu1 }
 0x667   :  { %v2650_v6 = vpop.f32.mrb[45].mxu1 }
 0x668   :  { %v2651_v5 = vadd.f32 %v2650_v6, %v2649_v13  ;;  %v2652_v28 = vpop.f32.mrb[46].mxu1  ;;  %v2931_v13 = vld [vmem:[%s3694_s10 + $0x50] sm:$0xff]  }
 0x669   :  { %v2653_v7 = vpop.f32.mrb[47].mxu1  ;;  %v2932_v6 = vld [vmem:[%s3694_s10 + $0x10] sm:$0xff]   ;;  %v2933_v28 = vld [vmem:[%s3694_s10 + $0xc8] sm:$0xff]   ;;  %2663 = vmatprep.subr.bf16.mxu1 %v2931_v13 }
 0x66a   :  { %v1723_v8 = vrot.slane %v2651_v5, 4  ;;  %v1729_v9 = vmul.f32 %v2651_v5, %v2651_v5  ;;  %v2935_v7 = vld [vmem:[%s3694_s10 + $0x58] sm:$0xff]   ;;  %2664 = vmatpush3.bf16.msra.mxu1 %v2932_v6 }
 0x66b   :  { %2665 = vmatprep.subr.bf16.mxu1 %v2935_v7 }
 0x66c   :  { %v1724_v14 = vadd.f32 %v2651_v5, %v1723_v8  ;;  %v1730_v15 = vrot.slane %v1729_v9, 4  ;;  %v2934_v8 = vld [vmem:[%s3694_s10 + $0x88] sm:$0xff]  }
 0x66e   :  { %v1725_v16 = vrot.slane %v1724_v14, 2  ;;  %v1731_v56 = vadd.f32 %v1730_v15, %v1729_v9  ;;  %v2936_v9 = vld [vmem:[%s3694_s10 + $0x18] sm:$0xff]  }
 0x66f   :  { %2666 = vmatpush3.bf16.msra.mxu1 %v2936_v9 }
 0x670   :  { %v1726_v60 = vadd.f32 %v1725_v16, %v1724_v14  ;;  %v1732_v0 = vrot.slane %v1731_v56, 2  ;;  %v2937_v14 = vld [vmem:[%s3694_s10 + $0xd0] sm:$0xff]  }
 0x672   :  { %v1727_v17 = vrot.slane %v1726_v60, 1  ;;  %v1733_v20 = vadd.f32 %v1732_v0, %v1731_v56  ;;  %v2939_v56 = vld [vmem:[%s3694_s10 + $0x60] sm:$0xff]  }
 0x673   :  { %v2940_v0 = vld [vmem:[%s3694_s10 + $0x20] sm:$0xff]   ;;  %2667 = vmatprep.subr.bf16.mxu1 %v2939_v56 }
 0x674   :  { %v1728_v19 = vadd.f32 %v1727_v17, %v1726_v60  ;;  %v1734_v27 = vrot.slane %v1733_v20, 1  ;;  %v2938_v60 = vld [vmem:[%s3694_s10 + $0x90] sm:$0xff]   ;;  %v2941_v17 = vld [vmem:[%s3694_s10 + $0xd8] sm:$0xff]   ;;  %2668 = vmatpush3.bf16.msra.mxu1 %v2940_v0 }
 0x676   :  { %v1735_v30 = vadd.f32 %v1734_v27, %v1733_v20  ;;  %v1736_v21 = vmul.f32 0.125, %v1728_v19  ;;  %v2943_v27 = vld [vmem:[%s3694_s10 + $0x68] sm:$0xff]  }
 0x677   :  { %2669 = vmatprep.subr.bf16.mxu1 %v2943_v27 }
 0x678   :  { %v1737_v32 = vmul.f32 0.125, %v1735_v30  ;;  %v1738_v36 = vmul.f32 %v1736_v21, %v1736_v21  ;;  %v2942_v30 = vld [vmem:[%s3694_s10 + $0x98] sm:$0xff]  }
 0x67a   :  { %v1739_v3 = vsub.f32 %v1737_v32, %v1738_v36  ;;  %v2945_v32 = vld [vmem:[%s3694_s10 + $0xe0] sm:$0xff]  }
 0x67c   :  { %v1740_v18 = vmax.f32 %v1739_v3, 0.0 }
 0x67e   :  { %v1741_v23 = vadd.f32 1e-05, %v1740_v18  ;;  %v2946_v18 = vld [vmem:[%s3694_s10 + $0xa0] sm:$0xff]  }
 0x680   :  { %2961 = vrsqrt.f32 %v1741_v23  ;;  %v2947_v23 = vld [vmem:[%s3694_s10 + $0x70] sm:$0xff]  }
 0x68a   :  { %v2962_v42 = vpop.eup %2961 }
 0x68b   :  { %v1743_v33 = vmul.f32 %v2962_v42, %v1722_v31 }
 0x68d   :  { %v1744_v43 = vmul.f32 %v1743_v33, %v1736_v21  ;;  %v1752_v48 = vrot.slane %v1743_v33, %v3177_v37  ;;  %v2944_v21 = vld [vmem:[%s3694_s10 + $0x28] sm:$0xff]  }
 0x68e   :  { %2670 = vmatpush3.bf16.msra.mxu1 %v2944_v21 }
 0x68f   :  { %v1746_v25 = vrot.slane %v1744_v43, 7  ;;  %v1753_v49 = vmul.f32 %v2651_v5, %v1752_v48  ;;  %v2949_v43 = vld [vmem:[%s3694_s10 + $0xe8] sm:$0xff]   ;;  %2671 = vmatprep.subr.bf16.mxu1 %v2947_v23 }
 0x690   :  { %v2950_v48 = vld [vmem:[%s3694_s10 + $0xa8] sm:$0xff]  }
 0x691   :  { %v1748_v34 = vsub.f32 %v1722_v31, %v1746_v25  ;;  %v2948_v31 = vld [vmem:[%s3694_s10 + $0x30] sm:$0xff]   ;;  %v2951_v25 = vld [vmem:[%s3694_s10 + $0x78] sm:$0xff]  }
 0x692   :  { %2672 = vmatpush3.bf16.msra.mxu1 %v2948_v31 }
 0x693   :  { %v1757_v26 = vrot.slane %v1748_v34, %v3180_v46  ;;  %v2952_v34 = vld [vmem:[%s3694_s10 + $0x38] sm:$0xff]   ;;  %2673 = vmatprep.subr.bf16.mxu1 %v2951_v25 }
 0x695   :  { %v1758_v47 = vadd.f32 %v1757_v26, %v1753_v49  ;;  %v2953_v49 = vld [vmem:[%s3694_s10 + $0xf0] sm:$0xff]  }
 0x696   :  { %2674 = vmatpush3.bf16.msra.mxu1 %v2952_v34 }
 0x697   :  { %vm1759_vm8 = vcmp.gt.f32.partialorder %v1758_v47, 0.0  ;;  %v1760_v50 = vmul.f32 0.2, %v1758_v47 }
 0x699   :  { %v1761_v58 = vsel %vm1759_vm8, %v1758_v47, %v1760_v50  ;;  %v2954_v50 = vld [vmem:[%s3694_s10 + $0xb0] sm:$0xff]  }
 0x69a   :  { %v1762_v51 = vpack.c.bf16 %v1761_v58, %v1761_v58  ;;  %v2955_v58 = vld [vmem:[%s3694_s10 + $0xf8] sm:$0xff]  }
 0x69c   :  { %v1776_v59 = vsel %vm1774_vm9, %v1762_v51, 0  ;;  %v1906_v40 = vrot.slane %v1762_v51, 2 }
 0x69d   :  { %2842 = vmatpush3.bf16.msra.mxu0 %v1776_v59 }
 0x69e   :  { %2847 = vmatprep.subr.bf16.mxu0 %v3006_v2  ;;  %v1908_v37 = vsel %vm1774_vm9, %v1906_v40, 0 }
 0x6a0   :  { %2844 = vmatmul.mubr.msk.bf16.vlgmr.msra.gmra.mrb[56].mxu0 %vm1770_vm10, %v2924_v35 }
 0x6a1   :  { %2848 = vmatpush3.bf16.msra.mxu0 %v1908_v37  ;;  %2849 = vmatprep.mubr.msk.bf16.mxu0 %vm3007_vm7, %v3006_v2  ;;  %v2930_v2 = vld [vmem:[%s3694_s10 + $0x80] sm:$0xff]  }
 0x6a2   :  { %2681 = vmatprep.subr.bf16.mxu0 %v2929_v12 }
 0x6a8   :  { %2850 = vmatmul.mubr.msk.bf16.vlgmr.msra.gmra.mrb[60].mxu0 %vm1770_vm10, %v2924_v35  ;;  %v2956_v35 = vld [vmem:[%s3694_s10 + $0xb8] sm:$0xff]  }
 0x6a9   :  { %2682 = vmatpush3.bf16.msra.mxu0 %v2930_v2 }
 0x6aa   :  { %2683 = vmatprep.subr.bf16.mxu0 %v2933_v28 }
 0x6ad   :  { %2684 = vmatpush3.bf16.msra.mxu0 %v2934_v8 }
 0x6ae   :  { %2685 = vmatprep.subr.bf16.mxu0 %v2937_v14 }
 0x6b1   :  { %2686 = vmatpush3.bf16.msra.mxu0 %v2938_v60 }
 0x6b2   :  { %2687 = vmatprep.subr.bf16.mxu0 %v2941_v17 }
 0x6b5   :  { %2688 = vmatpush3.bf16.msra.mxu0 %v2942_v30 }
 0x6b6   :  { %2689 = vmatprep.subr.bf16.mxu0 %v2945_v32 }
 0x6b9   :  { %2690 = vmatpush3.bf16.msra.mxu0 %v2946_v18 }
 0x6ba   :  { %2691 = vmatprep.subr.bf16.mxu0 %v2949_v43 }
 0x6bd   :  { %2692 = vmatpush3.bf16.msra.mxu0 %v2950_v48 }
 0x6be   :  { %2693 = vmatprep.subr.bf16.mxu0 %v2953_v49 }
 0x6c1   :  { %2694 = vmatpush3.bf16.msra.mxu0 %v2954_v50 }
 0x6c2   :  { %2695 = vmatprep.subr.bf16.mxu0 %v2955_v58 }
 0x6c5   :  { %2696 = vmatpush3.bf16.msra.mxu0 %v2956_v35 }
 0x773   :  { %v3504_v46 = vpop.f32.mrb[56].mxu0 }
 0x774   :  { %v1851_v4 = vrot.slane %v3504_v46, 7  ;;  %v1835_v53 = vrot.slane %v3504_v46, 5  ;;  %v2845_v41 = vpop.f32.mrb[57].mxu0  ;;  %v1843_v10 = vrot.slane %v3504_v46, 6  ;;  %v1820_v39 = vrot.slane %v3504_v46, 1 }
 0x775   :  { %v3508_v44 = vpop.f32.mrb[58].mxu0  ;;  %v1825_v29 = vrot.slane %v3504_v46, 2  ;;  %v1830_v51 = vrot.slane %v3504_v46, 3 }
 0x776   :  { %1853 = vrot.lane.b32.xlu1 %v1851_v4, %s3003_s30  ;;  %1837 = vrot.lane.b32.xlu0 %v1835_v53, %s2995_s15  ;;  %v2846_v62 = vpop.f32.mrb[59].mxu0  ;;  %v1875_v55 = vrot.slane %v3508_v44, 5  ;;  %v1883_v54 = vrot.slane %v3508_v44, 6  ;;  %v1860_v1 = vrot.slane %v3508_v44, 1  ;;  %v1891_v5 = vrot.slane %v3508_v44, 7 }
 0x777   :  { %v1865_v3 = vrot.slane %v3508_v44, 2  ;;  %v1870_v37 = vrot.slane %v3508_v44, 3 }
 0x77a   :  { %1845 = vrot.lane.b32.xlu0 %v1843_v10, %s2999_s19  ;;  %1822 = vrot.lane.b32.xlu1 %v1820_v39, %s2995_s15 }
 0x77b   :  { %v3522_v63 = vpop.f32.mrb[60].mxu0 }
 0x77c   :  { %v2851_v57 = vpop.f32.mrb[61].mxu0  ;;  %v1967_v24 = vrot.slane %v3522_v63, 5  ;;  %v1975_v15 = vrot.slane %v3522_v63, 6  ;;  %v1983_v16 = vrot.slane %v3522_v63, 7  ;;  %v1952_v20 = vrot.slane %v3522_v63, 1 }
 0x77d   :  { %v3526_v22 = vpop.f32.mrb[62].mxu0  ;;  %v1957_v36 = vrot.slane %v3522_v63, 2  ;;  %v1962_v42 = vrot.slane %v3522_v63, 3 }
 0x77e   :  { %1827 = vrot.lane.b32.xlu0 %v1825_v29, %s2999_s19  ;;  %1877 = vrot.lane.b32.xlu1 %v1875_v55, %s2995_s15  ;;  %v2852_v38 = vpop.f32.mrb[63].mxu0  ;;  %v2007_v19 = vrot.slane %v3526_v22, 5  ;;  %v1992_v33 = vrot.slane %v3526_v22, 1  ;;  %v2015_v26 = vrot.slane %v3526_v22, 6  ;;  %v2023_v47 = vrot.slane %v3526_v22, 7 }
 0x77f   :  { %v1997_v59 = vrot.slane %v3526_v22, 2  ;;  %v2002_v40 = vrot.slane %v3526_v22, 3 }
 0x782   :  { %1885 = vrot.lane.b32.xlu0 %v1883_v54, %s2999_s19  ;;  %1862 = vrot.lane.b32.xlu1 %v1860_v1, %s2995_s15 }
 0x786   :  { %1893 = vrot.lane.b32.xlu0 %v1891_v5, %s3003_s30  ;;  %1969 = vrot.lane.b32.xlu1 %v1967_v24, %s2995_s15 }
 0x78a   :  { %1977 = vrot.lane.b32.xlu0 %v1975_v15, %s2999_s19  ;;  %1985 = vrot.lane.b32.xlu1 %v1983_v16, %s3003_s30 }
 0x78e   :  { %1954 = vrot.lane.b32.xlu0 %v1952_v20, %s2995_s15  ;;  %2009 = vrot.lane.b32.xlu1 %v2007_v19, %s2995_s15 }
 0x792   :  { %1959 = vrot.lane.b32.xlu0 %v1957_v36, %s2999_s19  ;;  %1867 = vrot.lane.b32.xlu1 %v1865_v3, %s2999_s19 }
 0x796   :  { %1964 = vrot.lane.b32.xlu0 %v1962_v42, %s3003_s30  ;;  %1994 = vrot.lane.b32.xlu1 %v1992_v33, %s2995_s15 }
 0x79a   :  { %2017 = vrot.lane.b32.xlu0 %v2015_v26, %s2999_s19  ;;  %2025 = vrot.lane.b32.xlu1 %v2023_v47, %s3003_s30 }
 0x79e   :  { %1832 = vrot.lane.b32.xlu0 %v1830_v51, %s3003_s30  ;;  %1999 = vrot.lane.b32.xlu1 %v1997_v59, %s2999_s19 }
 0x7a2   :  { %2004 = vrot.lane.b32.xlu0 %v2002_v40, %s3003_s30  ;;  %1872 = vrot.lane.b32.xlu1 %v1870_v37, %s3003_s30 }
 0x7e8   :  { %v1854_v4 = vpop.permute.xlu1 %1853  ;;  %v1838_v53 = vpop.permute.xlu0 %1837 }
 0x7e9   :  { %v1840_v29 = vrot.slane %v1838_v53, 4  ;;  %v1856_v24 = vrot.slane %v1854_v4, 4 }
 0x7eb   :  { %v1842_v45 = vadd.f32 %v1840_v29, %v3504_v46 }
 0x7ec   :  { %v1846_v41 = vpop.permute.xlu0 %1845  ;;  %v1823_v62 = vpop.permute.xlu1 %1822 }
 0x7ed   :  { %v1848_v55 = vrot.slane %v1846_v41, 4  ;;  %v1824_v18 = vadd.f32 %v1823_v62, %v3504_v46 }
 0x7ef   :  { %v1850_v38 = vadd.f32 %v1848_v55, %v1842_v45 }
 0x7f0   :  { %v1828_v52 = vpop.permute.xlu0 %1827  ;;  %v1878_v61 = vpop.permute.xlu1 %1877 }
 0x7f1   :  { %v1858_v6 = vadd.f32 %v1856_v24, %v1850_v38  ;;  %v1880_v17 = vrot.slane %v1878_v61, 4  ;;  %v1829_v48 = vadd.f32 %v1828_v52, %v1824_v18 }
 0x7f3   :  { %v1900_v14 = vrot.slane %v1858_v6, 4  ;;  %v1882_v32 = vadd.f32 %v1880_v17, %v3508_v44 }
 0x7f4   :  { %v1886_v10 = vpop.permute.xlu0 %1885  ;;  %v1863_v39 = vpop.permute.xlu1 %1862 }
 0x7f5   :  { %v1888_v27 = vrot.slane %v1886_v10, 4  ;;  %v1864_v46 = vadd.f32 %v1863_v39, %v3508_v44 }
 0x7f7   :  { %v1890_v42 = vadd.f32 %v1888_v27, %v1882_v32 }
 0x7f8   :  { %v1894_v57 = vpop.permute.xlu0 %1893  ;;  %v1970_v11 = vpop.permute.xlu1 %1969 }
 0x7f9   :  { %v1972_v12 = vrot.slane %v1970_v11, 4  ;;  %v1896_v36 = vrot.slane %v1894_v57, 4 }
 0x7fb   :  { %v1974_v2 = vadd.f32 %v1972_v12, %v3522_v63  ;;  %v1898_v34 = vadd.f32 %v1896_v36, %v1890_v42 }
 0x7fc   :  { %v1978_v54 = vpop.permute.xlu0 %1977  ;;  %v1986_v1 = vpop.permute.xlu1 %1985 }
 0x7fd   :  { %v1980_v13 = vrot.slane %v1978_v54, 4  ;;  %v1988_v28 = vrot.slane %v1986_v1, 4  ;;  %v1903_v35 = vrot.slane %v1898_v34, 4  ;;  %v2530_v54 = vld [vmem:[%s3695_s11] ss:$0 sm:$0xff]  ;;  %s2967_s11 = scalar_lea.vmem %s2417_s20, 16 }
 0x7fe   :  { %p2968_p0 = scmp.ne.s32.totalorder %s2417_s20, %s2967_s11  ;;  %p2973_p2 = scmp.lt.s32.totalorder %s2971_s21, %s2967_s11 }
 0x7ff   :  { %v1982_v5 = vadd.f32 %v1980_v13, %v1974_v2 }
 0x800   :  { %v1955_v7 = vpop.permute.xlu0 %1954  ;;  %v2010_v8 = vpop.permute.xlu1 %2009  ;;  %p2974_p3 = por %p2973_p2, %p2972_p1 }
 0x801   :  { %v1990_v9 = vadd.f32 %v1988_v28, %v1982_v5  ;;  %v1956_v30 = vadd.f32 %v1955_v7, %v3522_v63  ;;  %v2012_v21 = vrot.slane %v2010_v8, 4 }
 0x802   :  { %p2975_p4 = pnand %p2974_p3, %p2968_p0 }
 0x803   :  { %v2528_v15 = vrot.slane %v1990_v9, 11  ;;  %v2014_v33 = vadd.f32 %v2012_v21, %v3526_v22 }
 0x804   :  { %v1960_v16 = vpop.permute.xlu0 %1959  ;;  %v1868_v56 = vpop.permute.xlu1 %1867 }
 0x805   :  { %v2047_v60 = vsel %vm2045_vm11, %v1900_v14, %v2528_v15  ;;  %v1961_v3 = vadd.f32 %v1960_v16, %v1956_v30  ;;  %v1869_v52 = vadd.f32 %v1868_v56, %v1864_v46 }
 0x806   :  { %v2051_v0 = vpack.c.bf16 %v2047_v60, %v2047_v60 }
 0x808   :  { %2349 = vmatprep.mubr.bf16.mxu1 %v2051_v0  ;;  %v1965_v20 = vpop.permute.xlu0 %1964  ;;  %v1995_v19 = vpop.permute.xlu1 %1994 }
 0x809   :  { %v1966_v43 = vadd.f32 %v1965_v20, %v1961_v3  ;;  %v1996_v58 = vadd.f32 %v1995_v19, %v3526_v22 }
 0x80b   :  { %v2037_v50 = vrot.slane %v1966_v43, 7 }
 0x80c   :  { %v2018_v23 = vpop.permute.xlu0 %2017  ;;  %v2026_v31 = vpop.permute.xlu1 %2025 }
 0x80d   :  { %v2020_v25 = vrot.slane %v2018_v23, 4  ;;  %v2028_v26 = vrot.slane %v2026_v31, 4 }
 0x80f   :  { %v2022_v49 = vadd.f32 %v2020_v25, %v2014_v33 }
 0x810   :  { %v1833_v47 = vpop.permute.xlu0 %1832  ;;  %v2000_v63 = vpop.permute.xlu1 %1999 }
 0x811   :  { %v2030_v51 = vadd.f32 %v2028_v26, %v2022_v49  ;;  %v1834_v59 = vadd.f32 %v1833_v47, %v1829_v48  ;;  %v2001_v4 = vadd.f32 %v2000_v63, %v1996_v58 }
 0x813   :  { %v2529_v40 = vrot.slane %v2030_v51, 11  ;;  %v2046_v37 = vsel %vm2045_vm11, %v1834_v59, %v2037_v50 }
 0x814   :  { %v2050_v53 = vpack.c.bf16 %v2046_v37, %v2046_v37  ;;  %v2005_v41 = vpop.permute.xlu0 %2004  ;;  %v1873_v62 = vpop.permute.xlu1 %1872 }
 0x815   :  { %v2006_v61 = vadd.f32 %v2005_v41, %v2001_v4  ;;  %v2049_v10 = vsel %vm2045_vm11, %v1903_v35, %v2529_v40  ;;  %v1874_v22 = vadd.f32 %v1873_v62, %v1869_v52 }
 0x816   :  { %2350 = vmatmul.mubr.bf16.vlgmr.msra.gmra.mrb[48].mxu1 %v2050_v53  ;;  %v2053_v29 = vpack.c.bf16 %v2049_v10, %v2049_v10 }
 0x817   :  { %v2039_v55 = vrot.slane %v2006_v61, 7 }
 0x818   :  { %2389 = vmatprep.mubr.bf16.mxu0 %v2053_v29 }
 0x819   :  { %v2048_v57 = vsel %vm2045_vm11, %v1874_v22, %v2039_v55 }
 0x81a   :  { %v2052_v44 = vpack.c.bf16 %v2048_v57, %v2048_v57 }
 0x81c   :  { %2390 = vmatmul.mubr.bf16.vlgmr.msra.gmra.mrb[64].mxu0 %v2052_v44 }
 0x8e9   :  { %v2675_v39 = vpop.f32.mrb[48].mxu1 }
 0x8ea   :  { %v2676_v11 = vpop.f32.mrb[49].mxu1 }
 0x8eb   :  { %v2677_v45 = vadd.f32 %v2676_v11, %v2675_v39  ;;  %v2678_v12 = vpop.f32.mrb[50].mxu1 }
 0x8ec   :  { %v2679_v38 = vpop.f32.mrb[51].mxu1 }
 0x8ed   :  { %v2352_v2 = vadd.f32 %v2677_v45, %v2530_v54 }
 0x8ef   :  { %v2697_v1 = vpop.f32.mrb[64].mxu0 }
 0x8f0   :  { %v2698_v24 = vpop.f32.mrb[65].mxu0 }
 0x8f1   :  { %v2699_v13 = vadd.f32 %v2698_v24, %v2697_v1  ;;  %v2700_v6 = vpop.f32.mrb[66].mxu0 }
 0x8f2   :  { %v2701_v5 = vpop.f32.mrb[67].mxu0 }
 0x8f3   :  { %v2392_v28 = vadd.f32 %v2699_v13, %v2352_v2 }
 0x8f5   :  { %v2398_v7 = vrot.slane %v2392_v28, 1 }
 0x8f7   :  { %2400 = vrot.lane.b32.xlu0 %v2398_v7, %s2999_s19 }
 0x969   :  { %v2401_v8 = vpop.permute.xlu0 %2400 }
 0x96a   :  { %v2402_v9 = vadd.f32 %v2401_v8, %v2392_v28 }
 0x96c   :  { %v2563_v14 = vmul.f32 -1.442695, %v2402_v9 }
 0x96e   :  { %2963 = vpow2.f32 %v2563_v14 }
 0x978   :  { %v2964_v15 = vpop.eup %2963 }
 0x979   :  { %v2406_v16 = vadd.f32 1.0, %v2964_v15 }
 0x97b   :  { %2965 = vrcp.f32 %v2406_v16 }
 0x985   :  { %v2966_v56 = vpop.eup %2965 }
 0x986   :  { %2409 = vst [vmem:[#allocation2] sm:$0x1] %v2966_v56 }
 0x987   :  { %2978 = shalt.err (!%p2975_p4)
}
 0x988   :  { %s2979_s4 = scalar_lea.hbm %s3696_s12, 16 }
 0x989   :  { %p2980_p5 = scmp.ne.s32.totalorder %s3696_s12, %s2979_s4  ;;  %p2983_p6 = scmp.lt.u32.totalorder %s2979_s4, %s3696_s12 }
 0x98b   :  { %p2985_p7 = pnand %p2983_p6, %p2980_p5 }
 0x98d   :  { %2988 = shalt.err (!%p2985_p7)
}
 0x98e   :  { %2419 = dma.vmem_to_hbm [thread:$0]  %s2417_s20, 16, %s3696_s12, [#allocation3]  }
 0x98f   :  { %2989 = dma.done.wait [#allocation3], 16  }
 0x990   :  { %2990 = vsyncadd [#allocation3], 4294967280 }
 0x991   :  { %2423 = vsyncpa [#allocation3], 1 }

</bundles_post_ra>
